<compile_context>
chip_gen: v7x
topology: tpu7x:2x2x1
jax: 0.10.0
libtpu: 0.0.40
codegen_flags: <defaults>
</compile_context>

<pallas_src>
import functools
import math

import jax
import jax.numpy as jnp
from jax import lax
from jax.experimental import pallas as pl
from jax.experimental.pallas import tpu as pltpu


_LANE = 128
_SUB = 8


def _rup(n, m):
    return ((n + m - 1) // m) * m


def _vmem_tile_bytes(shape, itemsize):
    """Bytes a VMEM tile of `shape` really occupies: last dim padded to 128
    lanes, second-to-last to 8 sublanes, leading dims multiply."""
    if len(shape) == 1:
        return _rup(int(shape[0]), _LANE) * itemsize
    lead = 1
    for d in shape[:-2]:
        lead *= int(d)
    return lead * _rup(int(shape[-2]), _SUB) * _rup(int(shape[-1]), _LANE) * itemsize


def _vmem_budget():
    """(per-step working-set budget, vmem_limit_bytes), generation aware."""
    cap = 64 << 20                      # conservative default if query fails
    try:
        cap = int(getattr(pltpu.get_tpu_info(), "vmem_capacity_bytes", cap))
    except Exception:
        pass
    if cap <= (64 << 20):               # v7x-class: 64 MiB physical per TC
        return 7 << 20, 48 << 20
    return 20 << 20, 96 << 20           # v5e / v6e: 128 MiB physical


def _step_vmem_bytes(TH, W, P, Cin, Cout, K, itemsize):
    """Padded-layout estimate of one grid step's VMEM working set."""
    Wp = W + 2 * P
    KKC = K * K * Cin
    n = 0
    n += 2 * _vmem_tile_bytes((TH, Wp, Cin), itemsize)        # main input (dbl buf)
    n += 2 * _vmem_tile_bytes((2 * P, Wp, Cin), itemsize)     # halo rows (dbl buf)
    n += 2 * _vmem_tile_bytes((KKC, Cout), itemsize)          # fused weights
    n += 2 * _vmem_tile_bytes((1, Cout), 4)                   # fused bias (f32)
    n += 2 * _vmem_tile_bytes((TH, W, Cout), itemsize)        # output block (dbl buf)
    n += _vmem_tile_bytes((TH + 2 * P, Wp, Cin), itemsize)    # window scratch
    n += 2 * _vmem_tile_bytes((TH * W, KKC), itemsize)        # im2col slab + shifted pieces
    n += _vmem_tile_bytes((TH * W, Cout), 4)                  # f32 matmul result
    return n


def _pick_tile_h(H, W, P, Cin, Cout, K, itemsize, budget, batch):
    """Largest row tile TH dividing H whose padded working set fits `budget`.
    Prefers TH % 2P == 0 (single consolidated halo block) and, when batch == 1,
    keeps >= 2 row tiles so both v7x TensorCores get work."""
    def legal(th):
        return H % th == 0 and (P == 0 or th % P == 0)

    def fits(th):
        return _step_vmem_bytes(th, W, P, Cin, Cout, K, itemsize) <= budget

    cands = [d for d in range(1, H + 1) if legal(d) and fits(d)]
    if not cands:                        # nothing fits the budget: smallest legal tile
        return min(d for d in range(1, H + 1) if legal(d))
    pool = cands
    if batch == 1 and any(d < H for d in pool):
        pool = [d for d in pool if d < H]
    even = [d for d in pool if P == 0 or d % (2 * P) == 0]
    return max(even) if even else max(pool)


def _make_kernel(TH, W, Cin, Cout, K, n_halo_blocks, halo_rows):
    """Fused (depthwise -> pointwise) conv on one (batch, row-tile) block."""

    def kernel(*refs):
        x_ref = refs[0]                               # (1, TH, Wp, Cin)
        halo_refs = refs[1:1 + n_halo_blocks]         # each (1, halo_rows, Wp, Cin)
        wf_ref = refs[1 + n_halo_blocks]              # (K*K*Cin, Cout)   fused weights
        b_ref = refs[2 + n_halo_blocks]               # (1, Cout)         fused bias (f32)
        o_ref = refs[3 + n_halo_blocks]               # (1, TH, W, Cout)
        win_ref = refs[4 + n_halo_blocks]             # (TH + 2P, Wp, Cin) scratch window

        # Assemble the halo'd row window in the persistent VMEM scratch with
        # leading-dim stores only (replaces the per-step jnp.concatenate).
        win_ref[0:TH] = x_ref[0]
        for j, h_ref in enumerate(halo_refs):
            win_ref[TH + j * halo_rows: TH + (j + 1) * halo_rows] = h_ref[0]

        # im2col: put the K*K tap windows side by side on the channel (lane)
        # axis so the whole separable conv is ONE MXU matmul with a K*K*Cin
        # contraction (instead of K*K lane-sparse matmuls + accumulator passes).
        cols = []
        for kh in range(K):
            for kw in range(K):
                cols.append(win_ref[kh:kh + TH, kw:kw + W, :])
        slab = cols[0] if len(cols) == 1 else jnp.concatenate(cols, axis=-1)
        slab = slab.reshape(TH * W, K * K * Cin)

        acc = jnp.dot(slab, wf_ref[...], preferred_element_type=jnp.float32)
        acc = acc + b_ref[...]                        # fused depthwise+pointwise bias
        o_ref[0] = acc.reshape(TH, W, Cout).astype(o_ref.dtype)

    return kernel


@functools.partial(jax.jit, static_argnames=("kernel_size", "padding"))
def separable_conv2d(x_nchw, dw_w, dw_b, pw_w, pw_b, *, kernel_size=3, padding=1):
    """x_nchw: (B, Cin, H, W). dw_w: (Cin, 1, K, K). pw_w: (Cout, Cin, 1, 1).
    Matches the PyTorch module with stride=1, dilation=1 ('same' output)."""
    B, Cin, H, W = x_nchw.shape
    K, P = kernel_size, padding
    assert K == 2 * P + 1, "stride=1 / dilation=1 'same' configuration expected"
    Cout = pw_w.shape[0]

    # NCHW -> NHWC (channels on lanes) + spatial zero pad (see TODOs above).
    x = jnp.transpose(x_nchw, (0, 2, 3, 1))                              # (B, H, W, Cin)
    x_pad = jnp.pad(x, ((0, 0), (P, P), (P, P), (0, 0))) if P else x
    Wp = W + 2 * P

    # Fold the depthwise taps into the pointwise weights: one fused matrix
    # wf[(kh*K + kw)*Cin + c, o] = dw[c, kh, kw] * pw[o, c].
    dww = jnp.transpose(dw_w[:, 0, :, :], (1, 2, 0)).astype(jnp.float32)  # (K, K, Cin)
    pww = jnp.transpose(pw_w[:, :, 0, 0], (1, 0)).astype(jnp.float32)     # (Cin, Cout)
    wf = (dww[:, :, :, None] * pww[None, None, :, :]).reshape(K * K * Cin, Cout)
    wf = wf.astype(x.dtype)               # match activation dtype for the MXU
    bf = (dw_b.astype(jnp.float32) @ pww + pw_b.astype(jnp.float32)).reshape(1, Cout)

    itemsize = jnp.dtype(x.dtype).itemsize
    budget, vmem_limit = _vmem_budget()
    TH = _pick_tile_h(H, W, P, Cin, Cout, K, itemsize, budget, B)
    n_t = H // TH

    if P:
        halo_rows = math.gcd(TH, 2 * P)                # usually 2P -> one halo block
        n_halo_blocks = (2 * P) // halo_rows
    else:
        halo_rows, n_halo_blocks = 1, 0
    blk = TH // halo_rows                              # halo index in halo_rows units

    in_specs = [pl.BlockSpec((1, TH, Wp, Cin), lambda b, t: (b, t, 0, 0))]
    for j in range(n_halo_blocks):
        in_specs.append(pl.BlockSpec(
            (1, halo_rows, Wp, Cin),
            lambda b, t, j=j, blk=blk: (b, (t + 1) * blk + j, 0, 0)))
    in_specs += [
        pl.BlockSpec((K * K * Cin, Cout), lambda b, t: (0, 0)),   # resident weights
        pl.BlockSpec((1, Cout), lambda b, t: (0, 0)),             # resident bias
    ]

    kernel = _make_kernel(TH, W, Cin, Cout, K, n_halo_blocks, halo_rows)

    out_nhwc = pl.pallas_call(
        kernel,
        out_shape=jax.ShapeDtypeStruct((B, H, W, Cout), x.dtype),
        grid_spec=pltpu.PrefetchScalarGridSpec(
            num_scalar_prefetch=0,
            grid=(B, n_t),
            in_specs=in_specs,
            out_specs=pl.BlockSpec((1, TH, W, Cout), lambda b, t: (b, t, 0, 0)),
            scratch_shapes=[pltpu.VMEM((TH + 2 * P, Wp, Cin), x.dtype)],
        ),
        compiler_params=pltpu.CompilerParams(
            dimension_semantics=("parallel", "parallel"),
            vmem_limit_bytes=vmem_limit),
    )(x_pad, *([x_pad] * n_halo_blocks), wf, bf)

    # NHWC -> NCHW to match the PyTorch output convention.
    return jnp.transpose(out_nhwc, (0, 3, 1, 2))


def _reference(x_nchw, dw_w, dw_b, pw_w, pw_b, padding=1):
    """Pure-JAX reference (lax conv) for verification."""
    Cin = x_nchw.shape[1]
    x = jnp.transpose(x_nchw, (0, 2, 3, 1))                              # NHWC
    dw_hwio = jnp.transpose(dw_w, (2, 3, 1, 0))                          # (K, K, 1, Cin)
    y = lax.conv_general_dilated(
        x, dw_hwio, window_strides=(1, 1),
        padding=((padding, padding), (padding, padding)),
        dimension_numbers=("NHWC", "HWIO", "NHWC"),
        feature_group_count=Cin)
    y = y + dw_b[None, None, None, :]
    pw_hwio = jnp.transpose(pw_w, (2, 3, 1, 0))                          # (1, 1, Cin, Cout)
    z = lax.conv_general_dilated(
        y, pw_hwio, window_strides=(1, 1), padding="VALID",
        dimension_numbers=("NHWC", "HWIO", "NHWC"))
    z = z + pw_b[None, None, None, :]
    return jnp.transpose(z, (0, 3, 1, 2))                                # NCHW


if __name__ == "__main__":
    B, Cin, Cout, H, W, K = 2, 4, 8, 16, 16, 3

    key = jax.random.PRNGKey(0)
    k1, k2, k3, k4, k5 = jax.random.split(key, 5)

    x = jax.random.normal(k1, (B, Cin, H, W), dtype=jnp.float32)
    # Parameter shapes match the PyTorch module's __init__.
    dw_w = jax.random.normal(k2, (Cin, 1, K, K), dtype=jnp.float32) * 0.1     # conv1.weight
    dw_b = jax.random.normal(k3, (Cin,), dtype=jnp.float32) * 0.1             # conv1.bias
    pw_w = jax.random.normal(k4, (Cout, Cin, 1, 1), dtype=jnp.float32) * 0.1  # pointwise.weight
    pw_b = jax.random.normal(k5, (Cout,), dtype=jnp.float32) * 0.1            # pointwise.bias

    out = separable_conv2d(x, dw_w, dw_b, pw_w, pw_b, kernel_size=K, padding=1)
    out = jax.block_until_ready(out)

    ref = _reference(x, dw_w, dw_b, pw_w, pw_b, padding=1)
    assert out.shape == (B, Cout, H, W)
    assert jnp.allclose(out, ref, atol=1e-4, rtol=1e-4)

    print("KERNEL_OK")
</pallas_src>

<mosaic_0001>
module attributes {stable_mosaic.version = 11 : i64} {
  func.func @kernel(%arg0: i32, %arg1: i32, %arg2: memref<1x16x18x4xf32, #tpu.memory_space<vmem>>, %arg3: memref<1x2x18x4xf32, #tpu.memory_space<vmem>>, %arg4: memref<36x8xf32, #tpu.memory_space<vmem>>, %arg5: memref<1x8xf32, #tpu.memory_space<vmem>>, %arg6: memref<1x16x16x8xf32, #tpu.memory_space<vmem>>, %arg7: memref<18x18x4xf32, #tpu.memory_space<vmem>>) attributes {dimension_semantics = [#tpu.dimension_semantics<parallel>, #tpu.dimension_semantics<parallel>], iteration_bounds = array<i64: 2, 1>, scalar_prefetch = 0 : i64, scratch_operands = 1 : i64, tpu.core_type = #tpu.core_type<tc>, window_params = [{transform_indices = @transform_0, window_bounds = array<i64: 1, 16, 18, 4>}, {transform_indices = @transform_1, window_bounds = array<i64: 1, 2, 18, 4>}, {pipeline_mode = #tpu.pipeline_mode<synchronous>, transform_indices = @transform_2, window_bounds = array<i64: 36, 8>}, {pipeline_mode = #tpu.pipeline_mode<synchronous>, transform_indices = @transform_3, window_bounds = array<i64: 1, 8>}, {transform_indices = @transform_4, window_bounds = array<i64: 1, 16, 16, 8>}]} {
    %c0 = arith.constant 0 : index
    %c0_0 = arith.constant 0 : index
    %c0_1 = arith.constant 0 : index
    %c0_2 = arith.constant 0 : index
    %0 = vector.load %arg2[%c0, %c0_0, %c0_1, %c0_2] : memref<1x16x18x4xf32, #tpu.memory_space<vmem>>, vector<1x16x18x4xf32>
    %1 = vector.shape_cast %0 : vector<1x16x18x4xf32> to vector<16x18x4xf32>
    %c0_3 = arith.constant 0 : index
    %c0_4 = arith.constant 0 : index
    %c0_5 = arith.constant 0 : index
    %2 = vector.load %arg7[%c0_3, %c0_4, %c0_5] : memref<18x18x4xf32, #tpu.memory_space<vmem>>, vector<16x18x4xf32>
    tpu.vector_store %arg7[%c0_3, %c0_4, %c0_5], %1 {strides = array<i32>} : memref<18x18x4xf32, #tpu.memory_space<vmem>>, vector<16x18x4xf32>,
    %c0_6 = arith.constant 0 : index
    %c0_7 = arith.constant 0 : index
    %c0_8 = arith.constant 0 : index
    %c0_9 = arith.constant 0 : index
    %3 = vector.load %arg3[%c0_6, %c0_7, %c0_8, %c0_9] : memref<1x2x18x4xf32, #tpu.memory_space<vmem>>, vector<1x2x18x4xf32>
    %4 = vector.shape_cast %3 : vector<1x2x18x4xf32> to vector<2x18x4xf32>
    %c16 = arith.constant 16 : index
    %c0_10 = arith.constant 0 : index
    %c0_11 = arith.constant 0 : index
    %5 = vector.load %arg7[%c16, %c0_10, %c0_11] : memref<18x18x4xf32, #tpu.memory_space<vmem>>, vector<2x18x4xf32>
    tpu.vector_store %arg7[%c16, %c0_10, %c0_11], %4 {strides = array<i32>} : memref<18x18x4xf32, #tpu.memory_space<vmem>>, vector<2x18x4xf32>,
    %c0_12 = arith.constant 0 : index
    %c0_13 = arith.constant 0 : index
    %c0_14 = arith.constant 0 : index
    %6 = vector.load %arg7[%c0_12, %c0_13, %c0_14] : memref<18x18x4xf32, #tpu.memory_space<vmem>>, vector<16x16x4xf32>
    %c0_15 = arith.constant 0 : index
    %c1 = arith.constant 1 : index
    %c0_16 = arith.constant 0 : index
    %7 = vector.load %arg7[%c0_15, %c1, %c0_16] : memref<18x18x4xf32, #tpu.memory_space<vmem>>, vector<16x16x4xf32>
    %c0_17 = arith.constant 0 : index
    %c2 = arith.constant 2 : index
    %c0_18 = arith.constant 0 : index
    %8 = vector.load %arg7[%c0_17, %c2, %c0_18] : memref<18x18x4xf32, #tpu.memory_space<vmem>>, vector<16x16x4xf32>
    %c1_19 = arith.constant 1 : index
    %c0_20 = arith.constant 0 : index
    %c0_21 = arith.constant 0 : index
    %9 = vector.load %arg7[%c1_19, %c0_20, %c0_21] : memref<18x18x4xf32, #tpu.memory_space<vmem>>, vector<16x16x4xf32>
    %c1_22 = arith.constant 1 : index
    %c1_23 = arith.constant 1 : index
    %c0_24 = arith.constant 0 : index
    %10 = vector.load %arg7[%c1_22, %c1_23, %c0_24] : memref<18x18x4xf32, #tpu.memory_space<vmem>>, vector<16x16x4xf32>
    %c1_25 = arith.constant 1 : index
    %c2_26 = arith.constant 2 : index
    %c0_27 = arith.constant 0 : index
    %11 = vector.load %arg7[%c1_25, %c2_26, %c0_27] : memref<18x18x4xf32, #tpu.memory_space<vmem>>, vector<16x16x4xf32>
    %c2_28 = arith.constant 2 : index
    %c0_29 = arith.constant 0 : index
    %c0_30 = arith.constant 0 : index
    %12 = vector.load %arg7[%c2_28, %c0_29, %c0_30] : memref<18x18x4xf32, #tpu.memory_space<vmem>>, vector<16x16x4xf32>
    %c2_31 = arith.constant 2 : index
    %c1_32 = arith.constant 1 : index
    %c0_33 = arith.constant 0 : index
    %13 = vector.load %arg7[%c2_31, %c1_32, %c0_33] : memref<18x18x4xf32, #tpu.memory_space<vmem>>, vector<16x16x4xf32>
    %c2_34 = arith.constant 2 : index
    %c2_35 = arith.constant 2 : index
    %c0_36 = arith.constant 0 : index
    %14 = vector.load %arg7[%c2_34, %c2_35, %c0_36] : memref<18x18x4xf32, #tpu.memory_space<vmem>>, vector<16x16x4xf32>
    %15 = tpu.concatenate %6, %7, %8, %9, %10, %11, %12, %13, %14 in 2 : vector<16x16x4xf32>, vector<16x16x4xf32>, vector<16x16x4xf32>, vector<16x16x4xf32>, vector<16x16x4xf32>, vector<16x16x4xf32>, vector<16x16x4xf32>, vector<16x16x4xf32>, vector<16x16x4xf32> -> vector<16x16x36xf32>
    %16 = vector.shape_cast %15 : vector<16x16x36xf32> to vector<256x36xf32>
    %c0_37 = arith.constant 0 : index
    %c0_38 = arith.constant 0 : index
    %17 = vector.load %arg4[%c0_37, %c0_38] : memref<36x8xf32, #tpu.memory_space<vmem>>, vector<36x8xf32>
    %cst = arith.constant dense<0.000000e+00> : vector<256x8xf32>
    %18 = tpu.matmul %16, %17, %cst {dimension_numbers = #tpu.dot_dimension_numbers<[1], [0], [0], [1], [0, 0, 1, 1], [], []>} : vector<256x36xf32>, vector<36x8xf32>, vector<256x8xf32> -> vector<256x8xf32>
    %c0_39 = arith.constant 0 : index
    %c0_40 = arith.constant 0 : index
    %19 = vector.load %arg5[%c0_39, %c0_40] : memref<1x8xf32, #tpu.memory_space<vmem>>, vector<1x8xf32>
    %20 = vector.broadcast %19 : vector<1x8xf32> to vector<256x8xf32>
    %21 = arith.addf %18, %20 : vector<256x8xf32>
    %22 = vector.shape_cast %21 : vector<256x8xf32> to vector<16x16x8xf32>
    %c0_41 = arith.constant 0 : index
    %c0_42 = arith.constant 0 : index
    %c0_43 = arith.constant 0 : index
    %c0_44 = arith.constant 0 : index
    %23 = vector.load %arg6[%c0_41, %c0_42, %c0_43, %c0_44] : memref<1x16x16x8xf32, #tpu.memory_space<vmem>>, vector<1x16x16x8xf32>
    %24 = vector.shape_cast %23 : vector<1x16x16x8xf32> to vector<16x16x8xf32>
    %25 = vector.shape_cast %22 : vector<16x16x8xf32> to vector<1x16x16x8xf32>
    tpu.vector_store %arg6[%c0_41, %c0_42, %c0_43, %c0_44], %25 {strides = array<i32>} : memref<1x16x16x8xf32, #tpu.memory_space<vmem>>, vector<1x16x16x8xf32>,
    return
  }
  func.func @transform_0(%arg0: i32, %arg1: i32) -> (i32, i32, i32, i32) {
    %c0_i32 = arith.constant 0 : i32
    %c0_i32_0 = arith.constant 0 : i32
    %c0_i32_1 = arith.constant 0 : i32
    return %arg0, %arg1, %c0_i32, %c0_i32_0 : i32, i32, i32, i32
  }
  func.func @transform_1(%arg0: i32, %arg1: i32) -> (i32, i32, i32, i32) {
    %c1_i32 = arith.constant 1 : i32
    %0 = arith.addi %arg1, %c1_i32 : i32
    %c8_i32 = arith.constant 8 : i32
    %1 = arith.muli %0, %c8_i32 : i32
    %c0_i32 = arith.constant 0 : i32
    %2 = arith.addi %1, %c0_i32 : i32
    %c0_i32_0 = arith.constant 0 : i32
    %c0_i32_1 = arith.constant 0 : i32
    %c0_i32_2 = arith.constant 0 : i32
    return %arg0, %2, %c0_i32_0, %c0_i32_1 : i32, i32, i32, i32
  }
  func.func @transform_2(%arg0: i32, %arg1: i32) -> (i32, i32) {
    %c0_i32 = arith.constant 0 : i32
    %c0_i32_0 = arith.constant 0 : i32
    %c0_i32_1 = arith.constant 0 : i32
    return %c0_i32, %c0_i32_0 : i32, i32
  }
  func.func @transform_3(%arg0: i32, %arg1: i32) -> (i32, i32) {
    %c0_i32 = arith.constant 0 : i32
    %c0_i32_0 = arith.constant 0 : i32
    %c0_i32_1 = arith.constant 0 : i32
    return %c0_i32, %c0_i32_0 : i32, i32
  }
  func.func @transform_4(%arg0: i32, %arg1: i32) -> (i32, i32, i32, i32) {
    %c0_i32 = arith.constant 0 : i32
    %c0_i32_0 = arith.constant 0 : i32
    %c0_i32_1 = arith.constant 0 : i32
    return %arg0, %arg1, %c0_i32, %c0_i32_0 : i32, i32, i32, i32
  }
}

</mosaic_0001>

<bundles_post_ra>
// kernel: separable_conv2d.1
= control target key start
LH: loop header
LB: loop body
LE: loop exit
PB: predicated region body
PF: predicated region fallthrough
CT: control target
= control target key end

     0   :  { %s2758_s15 = smov 0   ;;  %s2760_s16 = smov 0   ;;  %s4278_s0 = inlined_call_operand.vmem [shape: f32[2,18,18,4], index: 0, kind: input, shape index: {}, may-alias: {0,1}]   ;;  %s4279_s1 = inlined_call_operand.vmem [shape: f32[2,18,18,4], index: 1, kind: input, shape index: {}, may-alias: {0,1}]   ;;  %s4280_s2 = inlined_call_operand.vmem [shape: f32[36,8], index: 2, kind: input, shape index: {}]   ;;  %s4281_s3 = inlined_call_operand.vmem [shape: f32[1,8], index: 3, kind: input, shape index: {}]   ;;  %s4282_s4 = inlined_call_operand.vmem [shape: f32[2,16,16,8], index: 4, kind: output, shape index: {}]  }
   0x1   :  { %s2762_s17 = smov 0  }
   0x2 LB: > { %s26_s18 = sadd.s32 1, %s2719_s16  ;;  %p2499_p0 = scmp.ge.s32.totalorder %s2723_s17, 1  ;;  %s2723_s17 = sphi %s2762_s17, %s14_s17   ;;  %s2719_s16 = sphi %s2760_s16, %s4428_s16   ;;  %s2715_s15 = sphi %s2758_s15, %s4427_s15  }
   0x3   : > { %p28_p1 = scmp.ge.s32.totalorder %s26_s18, 2  ;;  %p220_p2 = scmp.lt.s32.totalorder %s2723_s17, 3 }
   0x5   : > { %s4430_s18 = smov (%p28_p1, %s26_s18), 0  ;;  %p221_p3 = pnand %p2499_p0, %p220_p2 }
   0x7   : > { %224 = sbr.rel (%p221_p3) target bundleno = 874 (0x36a), region = 36 }
   0xe   : > { %p279_p4 = scmp.lt.s32.totalorder %s2715_s15, 1  ;;  %vm368_vm0 = vcmask 31744   ;;  %vm371_vm1 = vcmask 25600   ;;  %s2725_s23 = smov 4   ;;  %vm2117_vm2 = vcmask 1043456   ;;  %vm1777_vm3 = vcmask 64512  }
   0xf   : > { %s2726_s28 = smov 8   ;;  %s2727_s29 = smov 12   ;;  %vm1810_vm4 = vcmask 97280   ;;  %vm1843_vm5 = vcmask 130048   ;;  %vm1876_vm6 = vcmask 162816   ;;  %vm1909_vm7 = vcmask 195584  }
  0x10   : > { %s4432_s15 = smov (!%p279_p4, %s2715_s15), 1  ;;  %s2728_s30 = smov 16   ;;  %vm1942_vm8 = vcmask 228352   ;;  %vm1975_vm9 = vcmask 261120   ;;  %vm2020_vm10 = vcmask 293888  }
  0x11   : > { %s2652_s19 = smul.u32 432, %s4432_s15  ;;  %s2729_s5 = smov 20  }
  0x12   : > { %s2730_s6 = smov 24   ;;  %s2731_s11 = smov 28  }
  0x13   : > { %s2784_s22 = scalar_lea.vmem %s4278_s0, %s2652_s19  ;;  %s2541_s24 = sadd.s32 384, %s2652_s19 }
  0x14   : > { %v323_v0 = vld [vmem:[%s2784_s22 + $0x18] sm:$0xff]  ;;  %v324_v1 = vld [vmem:[%s2784_s22 + $0x20] sm:$0xff]  ;;  %v321_v3 = vld [vmem:[%s2784_s22 + $0x8] sm:$0xff]  ;;  %s2955_s27 = scalar_lea.vmem %s4279_s1, %s2541_s24 }
  0x15   : > { %v320_v2 = vld [vmem:[%s2784_s22] sm:$0xff]  ;;  %373 = vst.msk [vmem:[#allocation2 + $0x18] sm:$0xff] %vm368_vm0, %v323_v0  ;;  %374 = vst.msk [vmem:[#allocation2 + $0x20] sm:$0xff] %vm368_vm0, %v324_v1  ;;  %v325_v4 = vld [vmem:[%s2784_s22 + $0x28] sm:$0x3] }
  0x16   : > { %369 = vst.msk [vmem:[#allocation2] sm:$0xff] %vm368_vm0, %v320_v2  ;;  %v322_v5 = vld [vmem:[%s2784_s22 + $0x10] sm:$0x3]  ;;  %370 = vst.msk [vmem:[#allocation2 + $0x8] sm:$0xff] %vm368_vm0, %v321_v3  ;;  %v327_v6 = vld [vmem:[%s2784_s22 + $0x38] sm:$0xff] }
  0x17   : > { %375 = vst.msk [vmem:[#allocation2 + $0x28] sm:$0x3] %vm371_vm1, %v325_v4  ;;  %372 = vst.msk [vmem:[#allocation2 + $0x10] sm:$0x3] %vm371_vm1, %v322_v5  ;;  %v328_v7 = vld [vmem:[%s2784_s22 + $0x40] sm:$0x3] }
  0x18   : > { %v326_v8 = vld [vmem:[%s2784_s22 + $0x30] sm:$0xff]  ;;  %377 = vst.msk [vmem:[#allocation2 + $0x38] sm:$0xff] %vm368_vm0, %v327_v6  ;;  %v331_v10 = vld [vmem:[%s2784_s22 + $0x58] sm:$0x3]  ;;  %v329_v11 = vld [vmem:[%s2784_s22 + $0x48] sm:$0xff] }
  0x19   : > { %378 = vst.msk [vmem:[#allocation2 + $0x40] sm:$0x3] %vm371_vm1, %v328_v7  ;;  %v330_v9 = vld [vmem:[%s2784_s22 + $0x50] sm:$0xff]  ;;  %381 = vst.msk [vmem:[#allocation2 + $0x58] sm:$0x3] %vm371_vm1, %v331_v10  ;;  %v333_v12 = vld [vmem:[%s2784_s22 + $0x68] sm:$0xff] }
  0x1a   : > { %376 = vst.msk [vmem:[#allocation2 + $0x30] sm:$0xff] %vm368_vm0, %v326_v8  ;;  %380 = vst.msk [vmem:[#allocation2 + $0x50] sm:$0xff] %vm368_vm0, %v330_v9  ;;  %v334_v13 = vld [vmem:[%s2784_s22 + $0x70] sm:$0x3]  ;;  %v332_v14 = vld [vmem:[%s2784_s22 + $0x60] sm:$0xff] }
  0x1b   : > { %379 = vst.msk [vmem:[#allocation2 + $0x48] sm:$0xff] %vm368_vm0, %v329_v11  ;;  %383 = vst.msk [vmem:[#allocation2 + $0x68] sm:$0xff] %vm368_vm0, %v333_v12  ;;  %v336_v15 = vld [vmem:[%s2784_s22 + $0x80] sm:$0xff]  ;;  %v337_v16 = vld [vmem:[%s2784_s22 + $0x88] sm:$0x3] }
  0x1c   : > { %384 = vst.msk [vmem:[#allocation2 + $0x70] sm:$0x3] %vm371_vm1, %v334_v13  ;;  %v335_v17 = vld [vmem:[%s2784_s22 + $0x78] sm:$0xff]  ;;  %387 = vst.msk [vmem:[#allocation2 + $0x88] sm:$0x3] %vm371_vm1, %v337_v16  ;;  %v338_v20 = vld [vmem:[%s2784_s22 + $0x90] sm:$0xff] }
  0x1d   : > { %382 = vst.msk [vmem:[#allocation2 + $0x60] sm:$0xff] %vm368_vm0, %v332_v14  ;;  %386 = vst.msk [vmem:[#allocation2 + $0x80] sm:$0xff] %vm368_vm0, %v336_v15  ;;  %v339_v18 = vld [vmem:[%s2784_s22 + $0x98] sm:$0xff]  ;;  %v340_v19 = vld [vmem:[%s2784_s22 + $0xa0] sm:$0x3] }
  0x1e   : > { %385 = vst.msk [vmem:[#allocation2 + $0x78] sm:$0xff] %vm368_vm0, %v335_v17  ;;  %389 = vst.msk [vmem:[#allocation2 + $0x98] sm:$0xff] %vm368_vm0, %v339_v18  ;;  %v342_v21 = vld [vmem:[%s2784_s22 + $0xb0] sm:$0xff]  ;;  %v343_v22 = vld [vmem:[%s2784_s22 + $0xb8] sm:$0x3] }
  0x1f   : > { %390 = vst.msk [vmem:[#allocation2 + $0xa0] sm:$0x3] %vm371_vm1, %v340_v19  ;;  %v341_v23 = vld [vmem:[%s2784_s22 + $0xa8] sm:$0xff]  ;;  %v2831_v24 = vld [vmem:[#allocation2 + $0x19] sm:$0xff]  ;;  %393 = vst.msk [vmem:[#allocation2 + $0xb8] sm:$0x3] %vm371_vm1, %v343_v22 }
  0x20   : > { %388 = vst.msk [vmem:[#allocation2 + $0x90] sm:$0xff] %vm368_vm0, %v338_v20  ;;  %392 = vst.msk [vmem:[#allocation2 + $0xb0] sm:$0xff] %vm368_vm0, %v342_v21  ;;  %v345_v25 = vld [vmem:[%s2784_s22 + $0xc8] sm:$0xff]  ;;  %v346_v26 = vld [vmem:[%s2784_s22 + $0xd0] sm:$0x3]  ;;  %757 = vrot.lane.b32.xlu1 %v2831_v24, %s2725_s23 }
  0x21   : > { %391 = vst.msk [vmem:[#allocation2 + $0xa8] sm:$0xff] %vm368_vm0, %v341_v23  ;;  %v463_v27 = vld [vmem:[#allocation2 + $0x1] sm:$0xff]  ;;  %395 = vst.msk [vmem:[#allocation2 + $0xc8] sm:$0xff] %vm368_vm0, %v345_v25  ;;  %v464_v30 = vld [vmem:[#allocation2 + $0x9] sm:$0xff] }
  0x22   : > { %396 = vst.msk [vmem:[#allocation2 + $0xd0] sm:$0x3] %vm371_vm1, %v346_v26  ;;  %753 = vrot.lane.b32.xlu0 %v463_v27, %s2725_s23  ;;  %v2843_v28 = vld [vmem:[#allocation2 + $0x21] sm:$0xff]  ;;  %v347_v33 = vld [vmem:[%s2784_s22 + $0xd8] sm:$0xff]  ;;  %v350_v39 = vld [vmem:[%s2784_s22 + $0xf0] sm:$0xff] }
  0x23   : > { %v344_v29 = vld [vmem:[%s2784_s22 + $0xc0] sm:$0xff]  ;;  %v349_v32 = vld [vmem:[%s2784_s22 + $0xe8] sm:$0x3]  ;;  %397 = vst.msk [vmem:[#allocation2 + $0xd8] sm:$0xff] %vm368_vm0, %v347_v33  ;;  %v351_v35 = vld [vmem:[%s2784_s22 + $0xf8] sm:$0xff] }
  0x24   : > { %394 = vst.msk [vmem:[#allocation2 + $0xc0] sm:$0xff] %vm368_vm0, %v344_v29  ;;  %v348_v31 = vld [vmem:[%s2784_s22 + $0xe0] sm:$0xff]  ;;  %759 = vrot.lane.b32.xlu1 %v2843_v28, %s2725_s23  ;;  %v2859_v36 = vld [vmem:[#allocation2 + $0x31] sm:$0xff]  ;;  %401 = vst.msk [vmem:[#allocation2 + $0xf8] sm:$0xff] %vm368_vm0, %v351_v35 }
  0x25   : > { %398 = vst.msk [vmem:[#allocation2 + $0xe0] sm:$0xff] %vm368_vm0, %v348_v31  ;;  %v2855_v34 = vld [vmem:[#allocation2 + $0x39] sm:$0xff]  ;;  %v2863_v38 = vld [vmem:[#allocation2 + $0x51] sm:$0xff]  ;;  %400 = vst.msk [vmem:[#allocation2 + $0xf0] sm:$0xff] %vm368_vm0, %v350_v39 }
  0x26   : > { %399 = vst.msk [vmem:[#allocation2 + $0xe8] sm:$0x3] %vm371_vm1, %v349_v32  ;;  %755 = vrot.lane.b32.xlu0 %v464_v30, %s2725_s23  ;;  %v352_v37 = vld [vmem:[%s2784_s22 + $0x100] sm:$0x3]  ;;  %v354_v40 = vld [vmem:[%s2784_s22 + $0x110] sm:$0xff]  ;;  %v353_v42 = vld [vmem:[%s2784_s22 + $0x108] sm:$0xff] }
  0x27   : > { %402 = vst.msk [vmem:[#allocation2 + $0x100] sm:$0x3] %vm371_vm1, %v352_v37  ;;  %v355_v41 = vld [vmem:[%s2784_s22 + $0x118] sm:$0x3]  ;;  %v357_v43 = vld [vmem:[%s2784_s22 + $0x128] sm:$0xff]  ;;  %v356_v46 = vld [vmem:[%s2784_s22 + $0x120] sm:$0xff] }
  0x28   : > { %763 = vrot.lane.b32.xlu1 %v2855_v34, %s2725_s23  ;;  %404 = vst.msk [vmem:[#allocation2 + $0x110] sm:$0xff] %vm368_vm0, %v354_v40  ;;  %v2877_v44 = vld [vmem:[#allocation2 + $0x49] sm:$0xff]  ;;  %403 = vst.msk [vmem:[#allocation2 + $0x108] sm:$0xff] %vm368_vm0, %v353_v42  ;;  %v360_v47 = vld [vmem:[%s2784_s22 + $0x140] sm:$0xff] }
  0x29   : > { %405 = vst.msk [vmem:[#allocation2 + $0x118] sm:$0x3] %vm371_vm1, %v355_v41  ;;  %v358_v45 = vld [vmem:[%s2784_s22 + $0x130] sm:$0x3]  ;;  %v361_v48 = vld [vmem:[%s2784_s22 + $0x148] sm:$0x3] }
  0x2a   : > { %761 = vrot.lane.b32.xlu0 %v2859_v36, %s2725_s23  ;;  %407 = vst.msk [vmem:[#allocation2 + $0x128] sm:$0xff] %vm368_vm0, %v357_v43  ;;  %406 = vst.msk [vmem:[#allocation2 + $0x120] sm:$0xff] %vm368_vm0, %v356_v46  ;;  %v359_v49 = vld [vmem:[%s2784_s22 + $0x138] sm:$0xff]  ;;  %v364_v51 = vld [vmem:[%s2784_s22 + $0x160] sm:$0x3] }
  0x2b   : > { %408 = vst.msk [vmem:[#allocation2 + $0x130] sm:$0x3] %vm371_vm1, %v358_v45  ;;  %411 = vst.msk [vmem:[#allocation2 + $0x148] sm:$0x3] %vm371_vm1, %v361_v48  ;;  %v363_v50 = vld [vmem:[%s2784_s22 + $0x158] sm:$0xff]  ;;  %v362_v52 = vld [vmem:[%s2784_s22 + $0x150] sm:$0xff] }
  0x2c   : > { %410 = vst.msk [vmem:[#allocation2 + $0x140] sm:$0xff] %vm368_vm0, %v360_v47  ;;  %409 = vst.msk [vmem:[#allocation2 + $0x138] sm:$0xff] %vm368_vm0, %v359_v49  ;;  %767 = vrot.lane.b32.xlu1 %v2863_v38, %s2725_s23  ;;  %v366_v53 = vld [vmem:[%s2784_s22 + $0x170] sm:$0xff]  ;;  %v367_v55 = vld [vmem:[%s2784_s22 + $0x178] sm:$0x3] }
  0x2d   : > { %413 = vst.msk [vmem:[#allocation2 + $0x158] sm:$0xff] %vm368_vm0, %v363_v50  ;;  %v472_v54 = vld [vmem:[#allocation2 + $0x69] sm:$0xff]  ;;  %412 = vst.msk [vmem:[#allocation2 + $0x150] sm:$0xff] %vm368_vm0, %v362_v52  ;;  %v2906_v57 = vld [vmem:[#allocation2 + $0x61] sm:$0xff] }
  0x2e   : > { %414 = vst.msk [vmem:[#allocation2 + $0x160] sm:$0x3] %vm371_vm1, %v364_v51  ;;  %765 = vrot.lane.b32.xlu0 %v2877_v44, %s2725_s23  ;;  %v365_v56 = vld [vmem:[%s2784_s22 + $0x168] sm:$0xff]  ;;  %417 = vst.msk [vmem:[#allocation2 + $0x178] sm:$0x3] %vm371_vm1, %v367_v55  ;;  %v473_v59 = vld [vmem:[#allocation2 + $0x79] sm:$0xff] }
  0x2f   : > { %416 = vst.msk [vmem:[#allocation2 + $0x170] sm:$0xff] %vm368_vm0, %v366_v53  ;;  %415 = vst.msk [vmem:[#allocation2 + $0x168] sm:$0xff] %vm368_vm0, %v365_v56  ;;  %v474_v58 = vld [vmem:[#allocation2 + $0x81] sm:$0xff]  ;;  %v476_v60 = vld [vmem:[#allocation2 + $0x99] sm:$0xff]  ;;  %s2732_s22 = smov 32  }
  0x30   : > { %771 = vrot.lane.b32.xlu1 %v472_v54, %s2725_s23  ;;  %v475_v61 = vld [vmem:[#allocation2 + $0x91] sm:$0xff]  ;;  %v477_v63 = vld [vmem:[#allocation2 + $0xa9] sm:$0xff]  ;;  %v479_v1 = vld [vmem:[#allocation2 + $0xc1] sm:$0xff] }
  0x31   : > { %v478_v62 = vld [vmem:[#allocation2 + $0xb1] sm:$0xff]  ;;  %v480_v0 = vld [vmem:[#allocation2 + $0xc9] sm:$0xff]  ;;  %v2921_v2 = vld [vmem:[#allocation2 + $0xe1] sm:$0xff] }
  0x32   : > { %769 = vrot.lane.b32.xlu0 %v2906_v57, %s2725_s23  ;;  %v2923_v3 = vld [vmem:[#allocation2 + $0xd9] sm:$0xff]  ;;  %v2931_v5 = vld [vmem:[#allocation2 + $0xf1] sm:$0xff]  ;;  %v2939_v7 = vld [vmem:[#allocation2 + $0x109] sm:$0xff] }
  0x33   : > { %v2929_v4 = vld [vmem:[#allocation2 + $0xf9] sm:$0xff]  ;;  %v2937_v6 = vld [vmem:[#allocation2 + $0x111] sm:$0xff]  ;;  %v488_v8 = vld [vmem:[#allocation2 + $0x129] sm:$0xff] }
  0x34   : > { %775 = vrot.lane.b32.xlu1 %v474_v58, %s2725_s23  ;;  %v2945_v9 = vld [vmem:[#allocation2 + $0x121] sm:$0xff]  ;;  %v489_v11 = vld [vmem:[#allocation2 + $0x139] sm:$0xff]  ;;  %v491_v15 = vld [vmem:[#allocation2 + $0x151] sm:$0xff] }
  0x35   : > { %v490_v10 = vld [vmem:[#allocation2 + $0x141] sm:$0xff]  ;;  %v492_v14 = vld [vmem:[#allocation2 + $0x159] sm:$0xff]  ;;  %v496_v18 = vld [vmem:[#allocation2 + $0xa] sm:$0xff] }
  0x36   : > { %773 = vrot.lane.b32.xlu0 %v473_v59, %s2725_s23  ;;  %v419_v12 = vld [vmem:[%s2955_s27 + $0x8] sm:$0xff]  ;;  %v418_v13 = vld [vmem:[%s2955_s27] sm:$0xff]  ;;  %v494_v16 = vld [vmem:[#allocation2 + $0x171] sm:$0xff] }
  0x37   : > { %426 = vst.msk [vmem:[#allocation2 + $0x188] sm:$0xff] %vm368_vm0, %v419_v12  ;;  %425 = vst.msk [vmem:[#allocation2 + $0x180] sm:$0xff] %vm368_vm0, %v418_v13  ;;  %v493_v17 = vld [vmem:[#allocation2 + $0x169] sm:$0xff]  ;;  %v2971_v21 = vld [vmem:[#allocation2 + $0x1a] sm:$0xff] }
  0x38   : > { %779 = vrot.lane.b32.xlu1 %v476_v60, %s2725_s23  ;;  %v495_v19 = vld [vmem:[#allocation2 + $0x2] sm:$0xff]  ;;  %v2977_v22 = vld [vmem:[#allocation2 + $0x3a] sm:$0xff]  ;;  %v2979_v23 = vld [vmem:[#allocation2 + $0x32] sm:$0xff] }
  0x39   : > { %v2969_v20 = vld [vmem:[#allocation2 + $0x22] sm:$0xff]  ;;  %v2985_v25 = vld [vmem:[#allocation2 + $0x52] sm:$0xff]  ;;  %v2987_v26 = vld [vmem:[#allocation2 + $0x4a] sm:$0xff] }
  0x3a   : > { %777 = vrot.lane.b32.xlu0 %v475_v61, %s2725_s23  ;;  %v2993_v27 = vld [vmem:[#allocation2 + $0x6a] sm:$0xff]  ;;  %v2995_v29 = vld [vmem:[#allocation2 + $0x62] sm:$0xff]  ;;  %v505_v31 = vld [vmem:[#allocation2 + $0x7a] sm:$0xff] }
  0x3b   : > { %v506_v30 = vld [vmem:[#allocation2 + $0x82] sm:$0xff]  ;;  %v508_v32 = vld [vmem:[#allocation2 + $0x9a] sm:$0xff]  ;;  %v507_v33 = vld [vmem:[#allocation2 + $0x92] sm:$0xff] }
  0x3c   : > { %783 = vrot.lane.b32.xlu1 %v478_v62, %s2725_s23  ;;  %v510_v35 = vld [vmem:[#allocation2 + $0xb2] sm:$0xff]  ;;  %v509_v37 = vld [vmem:[#allocation2 + $0xaa] sm:$0xff]  ;;  %v511_v40 = vld [vmem:[#allocation2 + $0xc2] sm:$0xff] }
  0x3d   : > { %v512_v39 = vld [vmem:[#allocation2 + $0xca] sm:$0xff]  ;;  %v3009_v41 = vld [vmem:[#allocation2 + $0xe2] sm:$0xff]  ;;  %v3011_v42 = vld [vmem:[#allocation2 + $0xda] sm:$0xff] }
  0x3e   : > { %781 = vrot.lane.b32.xlu0 %v477_v63, %s2725_s23  ;;  %v3017_v43 = vld [vmem:[#allocation2 + $0xfa] sm:$0xff]  ;;  %v3019_v45 = vld [vmem:[#allocation2 + $0xf2] sm:$0xff]  ;;  %v3027_v47 = vld [vmem:[#allocation2 + $0x10a] sm:$0xff] }
  0x3f   : > { %v3025_v46 = vld [vmem:[#allocation2 + $0x112] sm:$0xff]  ;;  %v3033_v48 = vld [vmem:[#allocation2 + $0x12a] sm:$0xff]  ;;  %v3035_v49 = vld [vmem:[#allocation2 + $0x122] sm:$0xff] }
  0x40   : > { %787 = vrot.lane.b32.xlu1 %v480_v0, %s2725_s23  ;;  %v522_v50 = vld [vmem:[#allocation2 + $0x142] sm:$0xff]  ;;  %v3043_v52 = vld [vmem:[#allocation2 + $0x13a] sm:$0xff]  ;;  %v523_v56 = vld [vmem:[#allocation2 + $0x152] sm:$0xff] }
  0x41   : > { %4294 = vst [vmem:[#allocation4_spill] sm:$0xff] %v3043_v52  ;;  %v524_v54 = vld [vmem:[#allocation2 + $0x15a] sm:$0xff]  ;;  %v526_v59 = vld [vmem:[#allocation2 + $0x172] sm:$0xff]  ;;  %v525_v61 = vld [vmem:[#allocation2 + $0x16a] sm:$0xff] }
  0x42   : > { %785 = vrot.lane.b32.xlu0 %v479_v1, %s2725_s23  ;;  %v3064_v0 = vld [vmem:[#allocation2 + $0x20] sm:$0xff]  ;;  %v3080_v13 = vld [vmem:[#allocation2 + $0x30] sm:$0xff] }
  0x43   : > { %4301 = vst [vmem:[#allocation11_spill] sm:$0xff] %v3064_v0 }
  0x44   : > { %791 = vrot.lane.b32.xlu1 %v2921_v2, %s2725_s23 }
  0x46   : > { %789 = vrot.lane.b32.xlu0 %v2923_v3, %s2725_s23 }
  0x48   : > { %795 = vrot.lane.b32.xlu1 %v2929_v4, %s2725_s23 }
  0x4a   : > { %793 = vrot.lane.b32.xlu0 %v2931_v5, %s2725_s23 }
  0x4c   : > { %799 = vrot.lane.b32.xlu1 %v2937_v6, %s2725_s23 }
  0x4e   : > { %797 = vrot.lane.b32.xlu0 %v2939_v7, %s2725_s23 }
  0x50   : > { %803 = vrot.lane.b32.xlu1 %v488_v8, %s2725_s23  ;;  %v3068_v8 = vld [vmem:[#allocation2 + $0x18] sm:$0xff] }
  0x51   : > { %4303 = vst [vmem:[#allocation13_spill] sm:$0xff] %v3068_v8 }
  0x52   : > { %801 = vrot.lane.b32.xlu0 %v2945_v9, %s2725_s23 }
  0x54   : > { %807 = vrot.lane.b32.xlu1 %v490_v10, %s2725_s23 }
  0x56   : > { %805 = vrot.lane.b32.xlu0 %v489_v11, %s2725_s23  ;;  %v3076_v11 = vld [vmem:[#allocation2 + $0x38] sm:$0xff] }
  0x58   : > { %811 = vrot.lane.b32.xlu1 %v492_v14, %s2725_s23 }
  0x5a   : > { %809 = vrot.lane.b32.xlu0 %v491_v15, %s2725_s23  ;;  %v3088_v15 = vld [vmem:[#allocation2 + $0x50] sm:$0xff] }
  0x5c   : > { %815 = vrot.lane.b32.xlu1 %v494_v16, %s2725_s23 }
  0x5e   : > { %813 = vrot.lane.b32.xlu0 %v493_v17, %s2725_s23  ;;  %v3092_v17 = vld [vmem:[#allocation2 + $0x48] sm:$0xff]  ;;  %s2542_s23 = sshll.u32 %s4432_s15, 8 }
  0x60   : > { %883 = vrot.lane.b32.xlu1 %v496_v18, %s2726_s28 }
  0x62   : > { %881 = vrot.lane.b32.xlu0 %v495_v19, %s2726_s28  ;;  %v3100_v19 = vld [vmem:[#allocation2 + $0x68] sm:$0xff] }
  0x64   : > { %887 = vrot.lane.b32.xlu1 %v2969_v20, %s2726_s28 }
  0x66   : > { %885 = vrot.lane.b32.xlu0 %v2971_v21, %s2726_s28 }
  0x68   : > { %891 = vrot.lane.b32.xlu1 %v2977_v22, %s2726_s28 }
  0x6a   : > { %889 = vrot.lane.b32.xlu0 %v2979_v23, %s2726_s28 }
  0x6c   : > { %895 = vrot.lane.b32.xlu1 %v2985_v25, %s2726_s28 }
  0x6e   : > { %893 = vrot.lane.b32.xlu0 %v2987_v26, %s2726_s28 }
  0x70   : > { %899 = vrot.lane.b32.xlu1 %v2993_v27, %s2726_s28 }
  0x72   : > { %897 = vrot.lane.b32.xlu0 %v2995_v29, %s2726_s28 }
  0x74   : > { %903 = vrot.lane.b32.xlu1 %v506_v30, %s2726_s28 }
  0x76   : > { %901 = vrot.lane.b32.xlu0 %v505_v31, %s2726_s28  ;;  %v3104_v31 = vld [vmem:[#allocation2 + $0x60] sm:$0xff] }
  0x78   : > { %907 = vrot.lane.b32.xlu1 %v508_v32, %s2726_s28 }
  0x7a   : > { %905 = vrot.lane.b32.xlu0 %v507_v33, %s2726_s28  ;;  %v3112_v33 = vld [vmem:[#allocation2 + $0x80] sm:$0xff] }
  0x7b   : > { %4308 = vst [vmem:[#allocation18_spill] sm:$0xff] %v3112_v33 }
  0x7c   : > { %911 = vrot.lane.b32.xlu1 %v510_v35, %s2726_s28 }
  0x7e   : > { %909 = vrot.lane.b32.xlu0 %v509_v37, %s2726_s28  ;;  %v3116_v37 = vld [vmem:[#allocation2 + $0x78] sm:$0xff] }
  0x80   : > { %915 = vrot.lane.b32.xlu1 %v512_v39, %s2726_s28 }
  0x82   : > { %913 = vrot.lane.b32.xlu0 %v511_v40, %s2726_s28  ;;  %v3124_v40 = vld [vmem:[#allocation2 + $0x98] sm:$0xff] }
  0x84   : > { %919 = vrot.lane.b32.xlu1 %v3009_v41, %s2726_s28 }
  0x86   : > { %917 = vrot.lane.b32.xlu0 %v3011_v42, %s2726_s28 }
  0x88   : > { %923 = vrot.lane.b32.xlu1 %v3017_v43, %s2726_s28 }
  0x8a   : > { %921 = vrot.lane.b32.xlu0 %v3019_v45, %s2726_s28 }
  0x8c   : > { %927 = vrot.lane.b32.xlu1 %v3025_v46, %s2726_s28 }
  0x8e   : > { %925 = vrot.lane.b32.xlu0 %v3027_v47, %s2726_s28 }
  0x90   : > { %931 = vrot.lane.b32.xlu1 %v3033_v48, %s2726_s28 }
  0x92   : > { %929 = vrot.lane.b32.xlu0 %v3035_v49, %s2726_s28  ;;  %v3041_v51 = vpop.permute.xlu1 %757 }
  0x93   : > { %4293 = vst [vmem:[#allocation3_spill] sm:$0xff] %v3041_v51 }
  0x94   : > { %v3045_v53 = vpop.permute.xlu0 %753  ;;  %935 = vrot.lane.b32.xlu1 %v522_v50, %s2726_s28 }
  0x95   : > { %4295 = vst [vmem:[#allocation5_spill] sm:$0xff] %v3045_v53  ;;  %v3232_v53 = vld [vmem:[#allocation2 + $0x170] sm:$0xff] }
  0x96   : > { %933 = vrot.lane.b32.xlu0 %v3043_v52, %s2726_s28  ;;  %v3050_v55 = vpop.permute.xlu1 %759 }
  0x97   : > { %4296 = vst [vmem:[#allocation6_spill] sm:$0xff] %v3050_v55  ;;  %v3176_v55 = vld [vmem:[#allocation2 + $0xf0] sm:$0xff] }
  0x98   : > { %v3052_v58 = vpop.permute.xlu0 %755  ;;  %939 = vrot.lane.b32.xlu1 %v524_v54, %s2726_s28  ;;  %v3128_v54 = vld [vmem:[#allocation2 + $0x90] sm:$0xff] }
  0x99   : > { %4297 = vst [vmem:[#allocation7_spill] sm:$0xff] %v3052_v58  ;;  %v3224_v58 = vld [vmem:[#allocation2 + $0x150] sm:$0xff] }
  0x9a   : > { %937 = vrot.lane.b32.xlu0 %v523_v56, %s2726_s28  ;;  %v3056_v60 = vpop.permute.xlu1 %763  ;;  %4330 = vst [vmem:[#allocation40_spill] sm:$0xff] %v3224_v58 }
  0x9b   : > { %4298 = vst [vmem:[#allocation8_spill] sm:$0xff] %v3056_v60  ;;  %v3160_v60 = vld [vmem:[#allocation2 + $0xe0] sm:$0xff] }
  0x9c   : > { %v3058_v62 = vpop.permute.xlu0 %761  ;;  %943 = vrot.lane.b32.xlu1 %v526_v59, %s2726_s28  ;;  %v3136_v59 = vld [vmem:[#allocation2 + $0xb0] sm:$0xff]  ;;  %4318 = vst [vmem:[#allocation28_spill] sm:$0xff] %v3160_v60 }
  0x9d   : > { %4299 = vst [vmem:[#allocation9_spill] sm:$0xff] %v3058_v62 }
  0x9e   : > { %941 = vrot.lane.b32.xlu0 %v525_v61, %s2726_s28  ;;  %v3062_v63 = vpop.permute.xlu1 %767  ;;  %s4095_s28 = scalar_lea.vmem %s4282_s4, %s2542_s23 }
  0x9f   : > { %4300 = vst [vmem:[#allocation10_spill] sm:$0xff] %v3062_v63  ;;  %v3152_v63 = vld [vmem:[#allocation2 + $0xc0] sm:$0xff] }
  0xa0   : > { %v3066_v1 = vpop.permute.xlu0 %765  ;;  %1011 = vrot.lane.b32.xlu1 %v3064_v0, %s2727_s29  ;;  %4316 = vst [vmem:[#allocation26_spill] sm:$0xff] %v3152_v63 }
  0xa1   : > { %4302 = vst [vmem:[#allocation12_spill] sm:$0xff] %v3066_v1 }
  0xa2   : > { %1009 = vrot.lane.b32.xlu0 %v3068_v8, %s2727_s29  ;;  %v3074_v10 = vpop.permute.xlu1 %771  ;;  %v3188_v8 = vld [vmem:[#allocation2 + $0x108] sm:$0xff] }
  0xa3   : > { %4304 = vst [vmem:[#allocation14_spill] sm:$0xff] %v3074_v10  ;;  %v3148_v10 = vld [vmem:[#allocation2 + $0xc8] sm:$0xff] }
  0xa4   : > { %v3078_v12 = vpop.permute.xlu0 %769  ;;  %1015 = vrot.lane.b32.xlu1 %v3076_v11, %s2727_s29  ;;  %4314 = vst [vmem:[#allocation24_spill] sm:$0xff] %v3148_v10 }
  0xa5   : > { %4305 = vst [vmem:[#allocation15_spill] sm:$0xff] %v3078_v12 }
  0xa6   : > { %1013 = vrot.lane.b32.xlu0 %v3080_v13, %s2727_s29  ;;  %v3086_v14 = vpop.permute.xlu1 %775 }
  0xa7   : > { %4306 = vst [vmem:[#allocation16_spill] sm:$0xff] %v3086_v14  ;;  %v3140_v14 = vld [vmem:[#allocation2 + $0xa8] sm:$0xff] }
  0xa8   : > { %v3090_v16 = vpop.permute.xlu0 %773  ;;  %1019 = vrot.lane.b32.xlu1 %v3088_v15, %s2727_s29 }
  0xa9   : > { %4307 = vst [vmem:[#allocation17_spill] sm:$0xff] %v3090_v16 }
  0xaa   : > { %1017 = vrot.lane.b32.xlu0 %v3092_v17, %s2727_s29  ;;  %v3098_v18 = vpop.permute.xlu1 %779 }
  0xac   : > { %v3102_v30 = vpop.permute.xlu0 %777  ;;  %1023 = vrot.lane.b32.xlu1 %v3100_v19, %s2727_s29 }
  0xae   : > { %1021 = vrot.lane.b32.xlu0 %v3104_v31, %s2727_s29  ;;  %v3110_v32 = vpop.permute.xlu1 %783 }
  0xb0   : > { %v3114_v35 = vpop.permute.xlu0 %781  ;;  %1027 = vrot.lane.b32.xlu1 %v3112_v33, %s2727_s29 }
  0xb2   : > { %1025 = vrot.lane.b32.xlu0 %v3116_v37, %s2727_s29  ;;  %v3122_v39 = vpop.permute.xlu1 %787 }
  0xb3   : > { %4309 = vst [vmem:[#allocation19_spill] sm:$0xff] %v3122_v39 }
  0xb4   : > { %v3126_v50 = vpop.permute.xlu0 %785  ;;  %1031 = vrot.lane.b32.xlu1 %v3124_v40, %s2727_s29 }
  0xb5   : > { %4310 = vst [vmem:[#allocation20_spill] sm:$0xff] %v3126_v50  ;;  %v3236_v50 = vld [vmem:[#allocation2 + $0x168] sm:$0xff] }
  0xb6   : > { %1029 = vrot.lane.b32.xlu0 %v3128_v54, %s2727_s29  ;;  %v3134_v56 = vpop.permute.xlu1 %791 }
  0xb7   : > { %4311 = vst [vmem:[#allocation21_spill] sm:$0xff] %v3134_v56  ;;  %v3164_v56 = vld [vmem:[#allocation2 + $0xd8] sm:$0xff] }
  0xb8   : > { %v3138_v61 = vpop.permute.xlu0 %789  ;;  %1035 = vrot.lane.b32.xlu1 %v3136_v59, %s2727_s29  ;;  %4320 = vst [vmem:[#allocation30_spill] sm:$0xff] %v3164_v56 }
  0xb9   : > { %4312 = vst [vmem:[#allocation22_spill] sm:$0xff] %v3138_v61 }
  0xba   : > { %1033 = vrot.lane.b32.xlu0 %v3140_v14, %s2727_s29  ;;  %v3146_v16 = vpop.permute.xlu1 %795 }
  0xbb   : > { %4313 = vst [vmem:[#allocation23_spill] sm:$0xff] %v3146_v16 }
  0xbc   : > { %v3150_v12 = vpop.permute.xlu0 %793  ;;  %1039 = vrot.lane.b32.xlu1 %v3148_v10, %s2727_s29  ;;  %v3212_v10 = vld [vmem:[#allocation2 + $0x138] sm:$0xff] }
  0xbd   : > { %4315 = vst [vmem:[#allocation25_spill] sm:$0xff] %v3150_v12  ;;  %v3172_v12 = vld [vmem:[#allocation2 + $0xf8] sm:$0xff] }
  0xbe   : > { %1037 = vrot.lane.b32.xlu0 %v3152_v63, %s2727_s29  ;;  %v3158_v1 = vpop.permute.xlu1 %799 }
  0xbf   : > { %4317 = vst [vmem:[#allocation27_spill] sm:$0xff] %v3158_v1 }
  0xc0   : > { %v3162_v62 = vpop.permute.xlu0 %797  ;;  %1043 = vrot.lane.b32.xlu1 %v3160_v60, %s2727_s29 }
  0xc1   : > { %4319 = vst [vmem:[#allocation29_spill] sm:$0xff] %v3162_v62  ;;  %v3184_v62 = vld [vmem:[#allocation2 + $0x110] sm:$0xff] }
  0xc2   : > { %1041 = vrot.lane.b32.xlu0 %v3164_v56, %s2727_s29  ;;  %v3170_v16 = vpop.permute.xlu1 %803  ;;  %v3200_v56 = vld [vmem:[#allocation2 + $0x120] sm:$0xff] }
  0xc3   : > { %4321 = vst [vmem:[#allocation31_spill] sm:$0xff] %v3170_v16 }
  0xc4   : > { %v3174_v0 = vpop.permute.xlu0 %801  ;;  %1047 = vrot.lane.b32.xlu1 %v3172_v12, %s2727_s29 }
  0xc5   : > { %4322 = vst [vmem:[#allocation32_spill] sm:$0xff] %v3174_v0  ;;  %v3196_v0 = vld [vmem:[#allocation2 + $0x128] sm:$0xff] }
  0xc6   : > { %1045 = vrot.lane.b32.xlu0 %v3176_v55, %s2727_s29  ;;  %v3182_v1 = vpop.permute.xlu1 %807 }
  0xc7   : > { %4323 = vst [vmem:[#allocation33_spill] sm:$0xff] %v3182_v1 }
  0xc8   : > { %v3186_v60 = vpop.permute.xlu0 %805  ;;  %1051 = vrot.lane.b32.xlu1 %v3184_v62, %s2727_s29 }
  0xc9   : > { %4324 = vst [vmem:[#allocation34_spill] sm:$0xff] %v3186_v60  ;;  %v3208_v60 = vld [vmem:[#allocation2 + $0x140] sm:$0xff] }
  0xca   : > { %1049 = vrot.lane.b32.xlu0 %v3188_v8, %s2727_s29  ;;  %v3194_v16 = vpop.permute.xlu1 %811 }
  0xcb   : > { %4325 = vst [vmem:[#allocation35_spill] sm:$0xff] %v3194_v16 }
  0xcc   : > { %v3198_v51 = vpop.permute.xlu0 %809  ;;  %1055 = vrot.lane.b32.xlu1 %v3196_v0, %s2727_s29 }
  0xcd   : > { %4326 = vst [vmem:[#allocation36_spill] sm:$0xff] %v3198_v51  ;;  %v3220_v51 = vld [vmem:[#allocation2 + $0x158] sm:$0xff] }
  0xce   : > { %1053 = vrot.lane.b32.xlu0 %v3200_v56, %s2727_s29  ;;  %v3206_v1 = vpop.permute.xlu1 %815  ;;  %4328 = vst [vmem:[#allocation38_spill] sm:$0xff] %v3220_v51 }
  0xd0   : > { %v3210_v61 = vpop.permute.xlu0 %813  ;;  %1059 = vrot.lane.b32.xlu1 %v3208_v60, %s2727_s29 }
  0xd2   : > { %1057 = vrot.lane.b32.xlu0 %v3212_v10, %s2727_s29  ;;  %v3218_v16 = vpop.permute.xlu1 %883 }
  0xd3   : > { %4327 = vst [vmem:[#allocation37_spill] sm:$0xff] %v3218_v16  ;;  %v559_v16 = vld [vmem:[#allocation2 + $0x188] sm:$0xff] }
  0xd4   : > { %v3222_v39 = vpop.permute.xlu0 %881  ;;  %1063 = vrot.lane.b32.xlu1 %v3220_v51, %s2727_s29  ;;  %v558_v51 = vld [vmem:[#allocation2 + $0x180] sm:$0xff] }
  0xd5   : > { %4329 = vst [vmem:[#allocation39_spill] sm:$0xff] %v3222_v39 }
  0xd6   : > { %1061 = vrot.lane.b32.xlu0 %v3224_v58, %s2727_s29  ;;  %v3230_v52 = vpop.permute.xlu1 %887 }
  0xd7   : > { %4331 = vst [vmem:[#allocation41_spill] sm:$0xff] %v3230_v52 }
  0xd8   : > { %v3234_v63 = vpop.permute.xlu0 %885  ;;  %1067 = vrot.lane.b32.xlu1 %v3232_v53, %s2727_s29 }
  0xd9   : > { %4332 = vst [vmem:[#allocation42_spill] sm:$0xff] %v3234_v63 }
  0xda   : > { %1065 = vrot.lane.b32.xlu0 %v3236_v50, %s2727_s29  ;;  %v3242_v39 = vpop.permute.xlu1 %891 }
  0xdb   : > { %4333 = vst [vmem:[#allocation43_spill] sm:$0xff] %v3242_v39 }
  0xdc   : > { %v3244_v33 = vpop.permute.xlu0 %889  ;;  %1071 = vrot.lane.b32.xlu1 %v559_v16, %s2727_s29 }
  0xde   : > { %1069 = vrot.lane.b32.xlu0 %v558_v51, %s2727_s29  ;;  %v3248_v52 = vpop.permute.xlu1 %895 }
  0xdf   : > { %4334 = vst [vmem:[#allocation44_spill] sm:$0xff] %v3248_v52  ;;  %v2011_v52 = vld [vmem:[%s4280_s2 + $0x18] sm:$0xff] }
  0xe0   : > { %v3250_v63 = vpop.permute.xlu0 %893  ;;  %1139 = vrot.lane.b32.xlu1 %v2843_v28, %s2728_s30 }
  0xe2   : > { %1137 = vrot.lane.b32.xlu0 %v2831_v24, %s2728_s30  ;;  %v3256_v58 = vpop.permute.xlu1 %899 }
  0xe3   : > { %4335 = vst [vmem:[#allocation45_spill] sm:$0xff] %v3256_v58 }
  0xe4   : > { %v3258_v39 = vpop.permute.xlu0 %897  ;;  %1143 = vrot.lane.b32.xlu1 %v2855_v34, %s2728_s30 }
  0xe5   : > { %4336 = vst [vmem:[#allocation46_spill] sm:$0xff] %v3258_v39 }
  0xe6   : > { %1141 = vrot.lane.b32.xlu0 %v2859_v36, %s2728_s30  ;;  %v3264_v51 = vpop.permute.xlu1 %903 }
  0xe7   : > { %4337 = vst [vmem:[#allocation47_spill] sm:$0xff] %v3264_v51 }
  0xe8   : > { %v3266_v16 = vpop.permute.xlu0 %901  ;;  %1147 = vrot.lane.b32.xlu1 %v2863_v38, %s2728_s30 }
  0xe9   : > { %4338 = vst [vmem:[#allocation48_spill] sm:$0xff] %v3266_v16 }
  0xea   : > { %1145 = vrot.lane.b32.xlu0 %v2877_v44, %s2728_s30  ;;  %v3272_v24 = vpop.permute.xlu1 %907 }
  0xec   : > { %v3274_v28 = vpop.permute.xlu0 %905  ;;  %1169 = vrot.lane.b32.xlu1 %v2923_v3, %s2728_s30 }
  0xee   : > { %1149 = vrot.lane.b32.xlu0 %v2906_v57, %s2728_s30  ;;  %v3280_v58 = vpop.permute.xlu1 %911 }
  0xf0   : > { %v3282_v51 = vpop.permute.xlu0 %909  ;;  %1265 = vrot.lane.b32.xlu1 %v2971_v21, %s2729_s5 }
  0xf2   : > { %1171 = vrot.lane.b32.xlu0 %v2921_v2, %s2728_s30  ;;  %v3288_v38 = vpop.permute.xlu1 %915 }
  0xf4   : > { %v3290_v44 = vpop.permute.xlu0 %913  ;;  %1267 = vrot.lane.b32.xlu1 %v2969_v20, %s2729_s5  ;;  %v2008_v20 = vld [vmem:[%s4280_s2] sm:$0xff] }
  0xf6   : > { %1297 = vrot.lane.b32.xlu0 %v3011_v42, %s2729_s5  ;;  %v3296_v57 = vpop.permute.xlu1 %919  ;;  %v2009_v42 = vld [vmem:[%s4280_s2 + $0x8] sm:$0xff] }
  0xf7   : > { %v2638_v16 = vpack.c.bf16 %v2009_v42, %v2008_v20 }
  0xf8   : > { %v3298_v3 = vpop.permute.xlu0 %917  ;;  %1393 = vrot.lane.b32.xlu1 %v3080_v13, %s2730_s6 }
  0xf9   : > { %2639 = vmatprep.subr.bf16.mxu0 %v2638_v16  ;;  %2646 = vmatprep.subr.bf16.mxu1 %v2638_v16 }
  0xfa   : > { %1299 = vrot.lane.b32.xlu0 %v3009_v41, %s2729_s5  ;;  %v3304_v2 = vpop.permute.xlu1 %923  ;;  %2641 = vmatpush3.bf16.msra.mxu0 %v2638_v16 }
  0xfb   : > { %2649 = vmatpush3.bf16.msra.mxu1 %v2638_v16 }
  0xfc   : > { %v3306_v21 = vpop.permute.xlu0 %921  ;;  %1395 = vrot.lane.b32.xlu1 %v3076_v11, %s2730_s6  ;;  %v2010_v11 = vld [vmem:[%s4280_s2 + $0x10] sm:$0xff] }
  0xfd   : > { %v2642_v20 = vpack.c.bf16 %v2011_v52, %v2010_v11 }
  0xfe   : > { %1425 = vrot.lane.b32.xlu0 %v3176_v55, %s2730_s6  ;;  %v3318_v41 = vpop.permute.xlu1 %927 }
  0xff   : > { %4339 = vst [vmem:[#allocation49_spill] sm:$0xff] %v3318_v41  ;;  %2643 = vmatprep.subr.bf16.mxu0 %v2642_v20  ;;  %2647 = vmatprep.subr.bf16.mxu1 %v2642_v20 }
 0x100   : > { %v3320_v39 = vpop.permute.xlu0 %925  ;;  %1521 = vrot.lane.b32.xlu1 %v2859_v36, %s2731_s11  ;;  %2645 = vmatpush3.bf16.msra.mxu0 %v2642_v20  ;;  %v2012_v36 = vld [vmem:[%s4280_s2 + $0x20] sm:$0xf] }
 0x101   : > { %2650 = vmatpush3.bf16.msra.mxu1 %v2642_v20  ;;  %2588 = vmatprep.subr.msk.mxu0 %vm2117_vm2, %v2012_v36 }
 0x102   : > { %1427 = vrot.lane.b32.xlu0 %v3172_v12, %s2730_s6  ;;  %v3332_v42 = vpop.permute.xlu1 %931  ;;  %2648 = vmatprep.subr.msk.mxu1 %vm2117_vm2, %v2012_v36 }
 0x103   : > { %4340 = vst [vmem:[#allocation50_spill] sm:$0xff] %v3332_v42 }
 0x104   : > { %v3334_v41 = vpop.permute.xlu0 %929  ;;  %1173 = vrot.lane.b32.xlu1 %v2931_v5, %s2728_s30  ;;  %2589 = vmatpush3.msk.msra.mxu0 %vm2117_vm2, %v2012_v36 }
 0x105   : > { %4341 = vst [vmem:[#allocation51_spill] sm:$0xff] %v3334_v41  ;;  %2651 = vmatpush3.msk.msra.mxu1 %vm2117_vm2, %v2012_v36 }
 0x106   : > { %1553 = vrot.lane.b32.xlu0 %v2931_v5, %s2731_s11  ;;  %v3343_v52 = vpop.permute.xlu1 %935 }
 0x107   : > { %4342 = vst [vmem:[#allocation52_spill] sm:$0xff] %v3343_v52 }
 0x108   : > { %v3345_v16 = vpop.permute.xlu0 %933  ;;  %1555 = vrot.lane.b32.xlu1 %v2929_v4, %s2731_s11 }
 0x109   : > { %4343 = vst [vmem:[#allocation53_spill] sm:$0xff] %v3345_v16 }
 0x10a   : > { %1523 = vrot.lane.b32.xlu0 %v2855_v34, %s2731_s11  ;;  %v3351_v5 = vpop.permute.xlu1 %939 }
 0x10b   : > { %4344 = vst [vmem:[#allocation54_spill] sm:$0xff] %v3351_v5 }
 0x10c   : > { %v3353_v11 = vpop.permute.xlu0 %937  ;;  %1681 = vrot.lane.b32.xlu1 %v3019_v45, %s2732_s22 }
 0x10d   : > { %4345 = vst [vmem:[#allocation55_spill] sm:$0xff] %v3353_v11 }
 0x10e   : > { %1649 = vrot.lane.b32.xlu0 %v2979_v23, %s2732_s22  ;;  %v3359_v20 = vpop.permute.xlu1 %943 }
 0x110   : > { %v3361_v52 = vpop.permute.xlu0 %941  ;;  %1269 = vrot.lane.b32.xlu1 %v2979_v23, %s2729_s5 }
 0x112   : > { %1175 = vrot.lane.b32.xlu0 %v2929_v4, %s2728_s30  ;;  %v3367_v34 = vpop.permute.xlu1 %1011 }
 0x114   : > { %v3369_v36 = vpop.permute.xlu0 %1009  ;;  %1651 = vrot.lane.b32.xlu1 %v2977_v22, %s2732_s22 }
 0x116   : > { %1301 = vrot.lane.b32.xlu0 %v3019_v45, %s2729_s5  ;;  %v3375_v5 = vpop.permute.xlu1 %1015 }
 0x118   : > { %v3377_v11 = vpop.permute.xlu0 %1013  ;;  %1271 = vrot.lane.b32.xlu1 %v2977_v22, %s2729_s5  ;;  %v659_v22 = vld [vmem:[#allocation2 + $0x49] sm:$0xff] }
 0x11a   : > { %1683 = vrot.lane.b32.xlu0 %v3017_v43, %s2732_s22  ;;  %v3383_v4 = vpop.permute.xlu1 %1019 }
 0x11c   : > { %v3385_v23 = vpop.permute.xlu0 %1017  ;;  %1397 = vrot.lane.b32.xlu1 %v3092_v17, %s2730_s6 }
 0x11e   : > { %1303 = vrot.lane.b32.xlu0 %v3017_v43, %s2729_s5  ;;  %v3391_v45 = vpop.permute.xlu1 %1023 }
 0x120   : > { %v3393_v16 = vpop.permute.xlu0 %1021  ;;  %1399 = vrot.lane.b32.xlu1 %v3088_v15, %s2730_s6  ;;  %v1758_v15 = vsel %vm368_vm0, %v3124_v40, %v3098_v18 }
 0x122   : > { %1429 = vrot.lane.b32.xlu0 %v3188_v8, %s2730_s6  ;;  %v3399_v42 = vpop.permute.xlu1 %1027 }
 0x123   : > { %4346 = vst [vmem:[#allocation56_spill] sm:$0xff] %v3399_v42 }
 0x124   : > { %v3401_v41 = vpop.permute.xlu0 %1025  ;;  %1525 = vrot.lane.b32.xlu1 %v659_v22, %s2731_s11  ;;  %v1757_v22 = vsel %vm368_vm0, %v3128_v54, %v3102_v30  ;;  %v1759_v30 = vsel %vm368_vm0, %v3140_v14, %v3114_v35 }
 0x125   : > { %4347 = vst [vmem:[#allocation57_spill] sm:$0xff] %v3401_v41  ;;  %v1790_v42 = vsel %vm1777_vm3, %v1757_v22, %v3274_v28  ;;  %v1792_v28 = vsel %vm1777_vm3, %v1759_v30, %v3282_v51  ;;  %v662_v30 = vld [vmem:[#allocation2 + $0x69] sm:$0xff] }
 0x126   : > { %1431 = vrot.lane.b32.xlu0 %v3184_v62, %s2730_s6  ;;  %v3406_v43 = vpop.permute.xlu1 %1031  ;;  %v1791_v62 = vsel %vm1777_vm3, %v1758_v15, %v3272_v24 }
 0x127   : > { %4348 = vst [vmem:[#allocation58_spill] sm:$0xff] %v3406_v43 }
 0x128   : > { %v3408_v17 = vpop.permute.xlu0 %1029  ;;  %1177 = vrot.lane.b32.xlu1 %v2939_v7, %s2728_s30 }
 0x129   : > { %4349 = vst [vmem:[#allocation59_spill] sm:$0xff] %v3408_v17  ;;  %v660_v17 = vld [vmem:[#allocation2 + $0x51] sm:$0xff] }
 0x12a   : > { %1557 = vrot.lane.b32.xlu0 %v2939_v7, %s2731_s11  ;;  %v1036_v43 = vpop.permute.xlu1 %1035  ;;  %v1760_v7 = vsel %vm368_vm0, %v3136_v59, %v3110_v32 }
 0x12b   : > { %v3425_v41 = vsel %vm1810_vm4, %v1791_v62, %v1036_v43  ;;  %v1793_v54 = vsel %vm1777_vm3, %v1760_v7, %v3280_v58 }
 0x12c   : > { %4350 = vst [vmem:[#allocation60_spill] sm:$0xff] %v3425_v41  ;;  %v1034_v18 = vpop.permute.xlu0 %1033  ;;  %1559 = vrot.lane.b32.xlu1 %v2937_v6, %s2731_s11 }
 0x12d   : > { %v3428_v40 = vsel %vm1810_vm4, %v1790_v42, %v1034_v18  ;;  %v1775_v18 = vsel %vm368_vm0, %v3236_v50, %v3210_v61 }
 0x12e   : > { %4351 = vst [vmem:[#allocation61_spill] sm:$0xff] %v3428_v40  ;;  %1527 = vrot.lane.b32.xlu0 %v660_v17, %s2731_s11  ;;  %v1040_v24 = vpop.permute.xlu1 %1039 }
 0x12f   : > { %v3444_v42 = vsel %vm1810_vm4, %v1793_v54, %v1040_v24  ;;  %v1808_v54 = vsel %vm1777_vm3, %v1775_v18, %v3361_v52  ;;  %v420_v18 = vld [vmem:[%s2955_s27 + $0x10] sm:$0x3] }
 0x130   : > { %4352 = vst [vmem:[#allocation62_spill] sm:$0xff] %v3444_v42  ;;  %v1038_v43 = vpop.permute.xlu0 %1037  ;;  %1685 = vrot.lane.b32.xlu1 %v3027_v47, %s2732_s22  ;;  %427 = vst.msk [vmem:[#allocation2 + $0x190] sm:$0x3] %vm371_vm1, %v420_v18  ;;  %v431_v18 = vld [vmem:[#allocation2] sm:$0xff] }
 0x131   : > { %v3447_v15 = vsel %vm1810_vm4, %v1792_v28, %v1038_v43 }
 0x132   : > { %4353 = vst [vmem:[#allocation63_spill] sm:$0xff] %v3447_v15  ;;  %1653 = vrot.lane.b32.xlu0 %v2987_v26, %s2732_s22  ;;  %v3453_v14 = vpop.permute.xlu1 %1043  ;;  %v4361_v15 = vld [vmem:[#allocation20_spill] sm:$0xff] }
 0x134   : > { %v3455_v58 = vpop.permute.xlu0 %1041  ;;  %1273 = vrot.lane.b32.xlu1 %v2987_v26, %s2729_s5 }
 0x136   : > { %1179 = vrot.lane.b32.xlu0 %v2937_v6, %s2728_s30  ;;  %v3461_v32 = vpop.permute.xlu1 %1047 }
 0x138   : > { %v3463_v35 = vpop.permute.xlu0 %1045  ;;  %1655 = vrot.lane.b32.xlu1 %v2985_v25, %s2732_s22 }
 0x13a   : > { %1305 = vrot.lane.b32.xlu0 %v3027_v47, %s2729_s5  ;;  %v3469_v59 = vpop.permute.xlu1 %1051 }
 0x13c   : > { %v3471_v51 = vpop.permute.xlu0 %1049  ;;  %1275 = vrot.lane.b32.xlu1 %v2985_v25, %s2729_s5  ;;  %v661_v25 = vld [vmem:[#allocation2 + $0x61] sm:$0xff] }
 0x13e   : > { %1687 = vrot.lane.b32.xlu0 %v3025_v46, %s2732_s22  ;;  %v3477_v6 = vpop.permute.xlu1 %1055 }
 0x140   : > { %v3479_v26 = vpop.permute.xlu0 %1053  ;;  %1401 = vrot.lane.b32.xlu1 %v3104_v31, %s2730_s6 }
 0x142   : > { %1307 = vrot.lane.b32.xlu0 %v3025_v46, %s2729_s5  ;;  %v3485_v47 = vpop.permute.xlu1 %1059 }
 0x144   : > { %v3487_v17 = vpop.permute.xlu0 %1057  ;;  %1403 = vrot.lane.b32.xlu1 %v3100_v19, %s2730_s6  ;;  %v1776_v19 = vsel %vm368_vm0, %v3232_v53, %v3206_v1 }
 0x146   : > { %1433 = vrot.lane.b32.xlu0 %v3200_v56, %s2730_s6  ;;  %v3493_v22 = vpop.permute.xlu1 %1063  ;;  %v678_v56 = vld [vmem:[#allocation2 + $0x129] sm:$0xff] }
 0x147   : > { %4354 = vst [vmem:[#allocation64_spill] sm:$0xff] %v3493_v22 }
 0x148   : > { %v3495_v62 = vpop.permute.xlu0 %1061  ;;  %1529 = vrot.lane.b32.xlu1 %v661_v25, %s2731_s11 }
 0x149   : > { %4355 = vst [vmem:[#allocation65_spill] sm:$0xff] %v3495_v62 }
 0x14a   : > { %1435 = vrot.lane.b32.xlu0 %v3196_v0, %s2730_s6  ;;  %v3500_v46 = vpop.permute.xlu1 %1067  ;;  %v1809_v0 = vsel %vm1777_vm3, %v1776_v19, %v3359_v20 }
 0x14b   : > { %4356 = vst [vmem:[#allocation66_spill] sm:$0xff] %v3500_v46  ;;  %v4363_v46 = vld [vmem:[#allocation5_spill] sm:$0xff] }
 0x14c   : > { %v3502_v31 = vpop.permute.xlu0 %1065  ;;  %1181 = vrot.lane.b32.xlu1 %v2945_v9, %s2728_s30  ;;  %v1745_v40 = vsel %vm368_vm0, %v431_v18, %v4363_v46 }
 0x14d   : > { %4357 = vst [vmem:[#allocation67_spill] sm:$0xff] %v3502_v31 }
 0x14e   : > { %1561 = vrot.lane.b32.xlu0 %v2945_v9, %s2731_s11  ;;  %v1072_v7 = vpop.permute.xlu1 %1071 }
 0x14f   : > { %v3519_v24 = vsel %vm1810_vm4, %v1809_v0, %v1072_v7 }
 0x150   : > { %4358 = vst [vmem:[#allocation68_spill] sm:$0xff] %v3519_v24  ;;  %v1070_v53 = vpop.permute.xlu0 %1069  ;;  %1563 = vrot.lane.b32.xlu1 %v678_v56, %s2731_s11 }
 0x151   : > { %v3522_v1 = vsel %vm1810_vm4, %v1808_v54, %v1070_v53  ;;  %v663_v54 = vld [vmem:[#allocation2 + $0x79] sm:$0xff] }
 0x152   : > { %4359 = vst [vmem:[#allocation69_spill] sm:$0xff] %v3522_v1  ;;  %1531 = vrot.lane.b32.xlu0 %v662_v30, %s2731_s11  ;;  %v3526_v9 = vpop.permute.xlu1 %1139  ;;  %v4362_v1 = vld [vmem:[#allocation26_spill] sm:$0xff] }
 0x153   : > { %v1761_v41 = vsel %vm368_vm0, %v4362_v1, %v4361_v15  ;;  %v695_v15 = vld [vmem:[#allocation2 + $0x7a] sm:$0xff] }
 0x154   : > { %v1138_v50 = vpop.permute.xlu0 %1137  ;;  %1689 = vrot.lane.b32.xlu1 %v3035_v49, %s2732_s22 }
 0x156   : > { %1657 = vrot.lane.b32.xlu0 %v2995_v29, %s2732_s22  ;;  %v3532_v61 = vpop.permute.xlu1 %1143 }
 0x158   : > { %v3534_v52 = vpop.permute.xlu0 %1141  ;;  %1183 = vrot.lane.b32.xlu1 %v678_v56, %s2728_s30 }
 0x15a   : > { %1151 = vrot.lane.b32.xlu0 %v662_v30, %s2728_s30  ;;  %v3538_v20 = vpop.permute.xlu1 %1147 }
 0x15c   : > { %v3540_v28 = vpop.permute.xlu0 %1145  ;;  %1309 = vrot.lane.b32.xlu1 %v3035_v49, %s2729_s5 }
 0x15e   : > { %1277 = vrot.lane.b32.xlu0 %v2995_v29, %s2729_s5  ;;  %v1170_v43 = vpop.permute.xlu1 %1169 }
 0x160   : > { %v3546_v25 = vpop.permute.xlu0 %1149  ;;  %1691 = vrot.lane.b32.xlu1 %v3033_v48, %s2732_s22 }
 0x162   : > { %1659 = vrot.lane.b32.xlu0 %v2993_v27, %s2732_s22  ;;  %v1266_v19 = vpop.permute.xlu1 %1265 }
 0x164   : > { %v3552_v56 = vpop.permute.xlu0 %1171  ;;  %1311 = vrot.lane.b32.xlu1 %v3033_v48, %s2729_s5  ;;  %v679_v48 = vld [vmem:[#allocation2 + $0x139] sm:$0xff] }
 0x166   : > { %1279 = vrot.lane.b32.xlu0 %v2993_v27, %s2729_s5  ;;  %v3558_v49 = vpop.permute.xlu1 %1267  ;;  %v4360_v27 = vld [vmem:[#allocation18_spill] sm:$0xff] }
 0x168   : > { %v1298_v29 = vpop.permute.xlu0 %1297  ;;  %1437 = vrot.lane.b32.xlu1 %v3212_v10, %s2730_s6 }
 0x16a   : > { %1405 = vrot.lane.b32.xlu0 %v3116_v37, %s2730_s6  ;;  %v1394_v0 = vpop.permute.xlu1 %1393 }
 0x16c   : > { %v3566_v7 = vpop.permute.xlu0 %1299  ;;  %1439 = vrot.lane.b32.xlu1 %v3208_v60, %s2730_s6  ;;  %v680_v60 = vld [vmem:[#allocation2 + $0x141] sm:$0xff] }
 0x16e   : > { %1407 = vrot.lane.b32.xlu0 %v4360_v27, %s2730_s6  ;;  %v3572_v30 = vpop.permute.xlu1 %1395  ;;  %v664_v27 = vld [vmem:[#allocation2 + $0x81] sm:$0xff] }
 0x170   : > { %v1426_v10 = vpop.permute.xlu0 %1425  ;;  %1565 = vrot.lane.b32.xlu1 %v679_v48, %s2731_s11 }
 0x172   : > { %1533 = vrot.lane.b32.xlu0 %v663_v54, %s2731_s11  ;;  %v1522_v37 = vpop.permute.xlu1 %1521 }
 0x174   : > { %v3576_v53 = vpop.permute.xlu0 %1427  ;;  %1185 = vrot.lane.b32.xlu1 %v679_v48, %s2728_s30  ;;  %v1794_v48 = vsel %vm1777_vm3, %v1761_v41, %v3290_v44 }
 0x175   : > { %v1827_v22 = vsel %vm1810_vm4, %v1794_v48, %v3455_v58  ;;  %v432_v58 = vld [vmem:[#allocation2 + $0x8] sm:$0xff] }
 0x176   : > { %1153 = vrot.lane.b32.xlu0 %v663_v54, %s2728_s30  ;;  %v3580_v42 = vpop.permute.xlu1 %1173  ;;  %v4364_v54 = vld [vmem:[#allocation39_spill] sm:$0xff]  ;;  %v1860_v46 = vsel %vm1843_vm5, %v1827_v22, %v1170_v43 }
 0x177   : > { %v1778_v31 = vsel %vm1777_vm3, %v1745_v40, %v4364_v54  ;;  %v1893_v41 = vsel %vm1876_vm6, %v1860_v46, %v1298_v29  ;;  %v4365_v40 = vld [vmem:[#allocation4_spill] sm:$0xff] }
 0x178   : > { %v1554_v24 = vpop.permute.xlu0 %1553  ;;  %1567 = vrot.lane.b32.xlu1 %v680_v60, %s2731_s11  ;;  %v1811_v1 = vsel %vm1810_vm4, %v1778_v31, %v3369_v36  ;;  %v1926_v54 = vsel %vm1909_vm7, %v1893_v41, %v1426_v10  ;;  %v421_v10 = vld [vmem:[%s2955_s27 + $0x18] sm:$0xff] }
 0x179   : > { %v1844_v44 = vsel %vm1843_vm5, %v1811_v1, %v1138_v50  ;;  %v1959_v22 = vsel %vm1942_vm8, %v1926_v54, %v1554_v24  ;;  %v4366_v1 = vld [vmem:[#allocation7_spill] sm:$0xff]  ;;  %428 = vst.msk [vmem:[#allocation2 + $0x198] sm:$0xff] %vm368_vm0, %v421_v10  ;;  %v4369_v54 = vld [vmem:[#allocation24_spill] sm:$0xff] }
 0x17a   : > { %1535 = vrot.lane.b32.xlu0 %v664_v27, %s2731_s11  ;;  %v1556_v62 = vpop.permute.xlu1 %1555  ;;  %v1877_v48 = vsel %vm1876_vm6, %v1844_v44, %v1266_v19  ;;  %v1746_v46 = vsel %vm368_vm0, %v432_v58, %v4366_v1  ;;  %v633_v10 = vld [vmem:[#allocation2 + $0x90] sm:$0xff] }
 0x17b   : > { %v1910_v36 = vsel %vm1909_vm7, %v1877_v48, %v1394_v0  ;;  %v4367_v0 = vld [vmem:[#allocation37_spill] sm:$0xff]  ;;  %v4368_v48 = vld [vmem:[#allocation19_spill] sm:$0xff] }
 0x17c   : > { %v1524_v18 = vpop.permute.xlu0 %1523  ;;  %1693 = vrot.lane.b32.xlu1 %v4365_v40, %s2732_s22  ;;  %v1943_v50 = vsel %vm1942_vm8, %v1910_v36, %v1522_v37  ;;  %v1779_v24 = vsel %vm1777_vm3, %v1746_v46, %v4367_v0  ;;  %v616_v37 = vld [vmem:[#allocation2 + $0x13a] sm:$0xff]  ;;  %v1762_v36 = vsel %vm368_vm0, %v4369_v54, %v4368_v48 }
 0x17d   : > { %v1812_v44 = vsel %vm1810_vm4, %v1779_v24, %v3367_v34  ;;  %v634_v24 = vld [vmem:[#allocation2 + $0x98] sm:$0xff] }
 0x17e   : > { %1661 = vrot.lane.b32.xlu0 %v695_v15, %s2732_s22  ;;  %v1682_v31 = vpop.permute.xlu1 %1681 }
 0x17f   : > { %v1992_v29 = vsel %vm1975_vm9, %v1959_v22, %v1682_v31  ;;  %v712_v22 = vld [vmem:[#allocation2 + $0x142] sm:$0xff] }
 0x180   : > { %v1650_v43 = vpop.permute.xlu0 %1649  ;;  %1187 = vrot.lane.b32.xlu1 %v680_v60, %s2728_s30  ;;  %2614 = vmatprep.mubr.msk.f32.mxu1 %vm2020_vm10, %v1992_v29  ;;  %v1845_v60 = vsel %vm1843_vm5, %v1812_v44, %v3526_v9  ;;  %v1795_v9 = vsel %vm1777_vm3, %v1762_v36, %v3288_v38  ;;  %v4371_v44 = vld [vmem:[#allocation38_spill] sm:$0xff] }
 0x181   : > { %v1976_v19 = vsel %vm1975_vm9, %v1943_v50, %v1650_v43  ;;  %v1878_v58 = vsel %vm1876_vm6, %v1845_v60, %v3558_v49  ;;  %v696_v50 = vld [vmem:[#allocation2 + $0x82] sm:$0xff]  ;;  %v1828_v43 = vsel %vm1810_vm4, %v1795_v9, %v3453_v14  ;;  %v681_v60 = vld [vmem:[#allocation2 + $0x151] sm:$0xff] }
 0x182   : > { %1155 = vrot.lane.b32.xlu0 %v664_v27, %s2728_s30  ;;  %2590 = vmatprep.mubr.msk.f32.mxu0 %vm2020_vm10, %v1976_v19  ;;  %v3622_v41 = vpop.permute.xlu1 %1269  ;;  %v422_v27 = vld [vmem:[%s2955_s27 + $0x20] sm:$0xff]  ;;  %v1911_v34 = vsel %vm1909_vm7, %v1878_v58, %v3572_v30  ;;  %v1861_v30 = vsel %vm1843_vm5, %v1828_v43, %v3552_v56  ;;  %v423_v56 = vld [vmem:[%s2955_s27 + $0x28] sm:$0x3] }
 0x183   : > { %429 = vst.msk [vmem:[#allocation2 + $0x1a0] sm:$0xff] %vm368_vm0, %v422_v27  ;;  %v1944_v49 = vsel %vm1942_vm8, %v1911_v34, %v1524_v18  ;;  %v1894_v38 = vsel %vm1876_vm6, %v1861_v30, %v3566_v7  ;;  %v665_v27 = vld [vmem:[#allocation2 + $0x91] sm:$0xff]  ;;  %v4372_v34 = vld [vmem:[#allocation22_spill] sm:$0xff] }
 0x184   : > { %v3626_v40 = vpop.permute.xlu0 %1175  ;;  %1313 = vrot.lane.b32.xlu1 %v616_v37, %s2729_s5  ;;  %430 = vst.msk [vmem:[#allocation2 + $0x1a8] sm:$0x3] %vm371_vm1, %v423_v56  ;;  %v4376_v30 = vld [vmem:[#allocation42_spill] sm:$0xff] }
 0x186   : > { %1281 = vrot.lane.b32.xlu0 %v695_v15, %s2729_s5  ;;  %v1652_v31 = vpop.permute.xlu1 %1651  ;;  %v1927_v15 = vsel %vm1909_vm7, %v1894_v38, %v3576_v53  ;;  %v4370_v53 = vld [vmem:[#allocation40_spill] sm:$0xff] }
 0x187   : > { %v1977_v29 = vsel %vm1975_vm9, %v1944_v49, %v1652_v31  ;;  %v1960_v14 = vsel %vm1942_vm8, %v1927_v15, %v1556_v62  ;;  %v4374_v49 = vld [vmem:[#allocation3_spill] sm:$0xff]  ;;  %v4375_v31 = vld [vmem:[#allocation13_spill] sm:$0xff] }
 0x188   : > { %v1302_v1 = vpop.permute.xlu0 %1301  ;;  %1695 = vrot.lane.b32.xlu1 %v712_v22, %s2732_s22  ;;  %2591 = vmatmul.mubr.msk.f32.vlgmr.msra.gmra.mrb[0].mxu0 %vm2020_vm10, %v1977_v29  ;;  %v682_v29 = vld [vmem:[#allocation2 + $0x159] sm:$0xff] }
 0x18a   : > { %1663 = vrot.lane.b32.xlu0 %v696_v50, %s2732_s22  ;;  %v3654_v18 = vpop.permute.xlu1 %1271 }
 0x18c   : > { %v1684_v46 = vpop.permute.xlu0 %1683  ;;  %1315 = vrot.lane.b32.xlu1 %v712_v22, %s2729_s5  ;;  %v4373_v22 = vld [vmem:[#allocation30_spill] sm:$0xff] }
 0x18d   : > { %v1993_v19 = vsel %vm1975_vm9, %v1960_v14, %v1684_v46  ;;  %v1763_v9 = vsel %vm368_vm0, %v4373_v22, %v4372_v34  ;;  %v666_v46 = vld [vmem:[#allocation2 + $0x99] sm:$0xff]  ;;  %v4377_v22 = vld [vmem:[#allocation6_spill] sm:$0xff] }
 0x18e   : > { %1283 = vrot.lane.b32.xlu0 %v696_v50, %s2729_s5  ;;  %2615 = vmatmul.mubr.msk.f32.vlgmr.msra.gmra.mrb[0].mxu1 %vm2020_vm10, %v1993_v19  ;;  %v1398_v7 = vpop.permute.xlu1 %1397  ;;  %v1747_v50 = vsel %vm368_vm0, %v4375_v31, %v4374_v49  ;;  %v1796_v43 = vsel %vm1777_vm3, %v1763_v9, %v3298_v3  ;;  %v4378_v9 = vld [vmem:[#allocation11_spill] sm:$0xff] }
 0x18f   : > { %v1780_v38 = vsel %vm1777_vm3, %v1747_v50, %v4376_v30  ;;  %v1829_v15 = vsel %vm1810_vm4, %v1796_v43, %v3463_v35  ;;  %v4380_v30 = vld [vmem:[#allocation21_spill] sm:$0xff] }
 0x190   : > { %v3663_v0 = vpop.permute.xlu0 %1303  ;;  %1441 = vrot.lane.b32.xlu1 %v4370_v53, %s2730_s6  ;;  %v1813_v19 = vsel %vm1810_vm4, %v1780_v38, %v3377_v11  ;;  %v1862_v56 = vsel %vm1843_vm5, %v1829_v15, %v3580_v42  ;;  %v4381_v38 = vld [vmem:[#allocation28_spill] sm:$0xff] }
 0x191   : > { %v1846_v3 = vsel %vm1843_vm5, %v1813_v19, %v3534_v52  ;;  %v1895_v53 = vsel %vm1876_vm6, %v1862_v56, %v1302_v1  ;;  %v1764_v15 = vsel %vm368_vm0, %v4381_v38, %v4380_v30 }
 0x192   : > { %1409 = vrot.lane.b32.xlu0 %v633_v10, %s2730_s6  ;;  %v1400_v62 = vpop.permute.xlu1 %1399 }
 0x194   : > { %v1430_v37 = vpop.permute.xlu0 %1429  ;;  %1443 = vrot.lane.b32.xlu1 %v4371_v44, %s2730_s6  ;;  %v713_v44 = vld [vmem:[#allocation2 + $0x152] sm:$0xff] }
 0x195   : > { %v1928_v35 = vsel %vm1909_vm7, %v1895_v53, %v1430_v37 }
 0x196   : > { %1411 = vrot.lane.b32.xlu0 %v634_v24, %s2730_s6  ;;  %v1526_v58 = vpop.permute.xlu1 %1525  ;;  %v1879_v24 = vsel %vm1876_vm6, %v1846_v3, %v3622_v41  ;;  %v1748_v41 = vsel %vm368_vm0, %v4378_v9, %v4377_v22  ;;  %v667_v9 = vld [vmem:[#allocation2 + $0xa9] sm:$0xff] }
 0x197   : > { %v1912_v11 = vsel %vm1909_vm7, %v1879_v24, %v1398_v7  ;;  %v4379_v7 = vld [vmem:[#allocation41_spill] sm:$0xff] }
 0x198   : > { %v1432_v48 = vpop.permute.xlu0 %1431  ;;  %1569 = vrot.lane.b32.xlu1 %v681_v60, %s2731_s11  ;;  %v1945_v52 = vsel %vm1942_vm8, %v1912_v11, %v1526_v58 }
 0x19a   : > { %1537 = vrot.lane.b32.xlu0 %v665_v27, %s2731_s11  ;;  %v3673_v54 = vpop.permute.xlu1 %1177 }
 0x19c   : > { %v1558_v36 = vpop.permute.xlu0 %1557  ;;  %1189 = vrot.lane.b32.xlu1 %v681_v60, %s2728_s30 }
 0x19d   : > { %v1961_v42 = vsel %vm1942_vm8, %v1928_v35, %v1558_v36  ;;  %v1781_v36 = vsel %vm1777_vm3, %v1748_v41, %v4379_v7 }
 0x19e   : > { %1157 = vrot.lane.b32.xlu0 %v665_v27, %s2728_s30  ;;  %v1560_v14 = vpop.permute.xlu1 %1559  ;;  %v697_v27 = vld [vmem:[#allocation2 + $0x92] sm:$0xff]  ;;  %v1814_v58 = vsel %vm1810_vm4, %v1781_v36, %v3375_v5  ;;  %v1797_v5 = vsel %vm1777_vm3, %v1764_v15, %v3296_v57  ;;  %v714_v57 = vld [vmem:[#allocation2 + $0x15a] sm:$0xff] }
 0x19f   : > { %v1847_v31 = vsel %vm1843_vm5, %v1814_v58, %v3532_v61  ;;  %v1830_v3 = vsel %vm1810_vm4, %v1797_v5, %v3461_v32  ;;  %v698_v32 = vld [vmem:[#allocation2 + $0x9a] sm:$0xff]  ;;  %v684_v5 = vld [vmem:[#allocation2 + $0x171] sm:$0xff] }
 0x1a0   : > { %v1528_v10 = vpop.permute.xlu0 %1527  ;;  %1571 = vrot.lane.b32.xlu1 %v682_v29, %s2731_s11  ;;  %v1880_v43 = vsel %vm1876_vm6, %v1847_v31, %v3654_v18  ;;  %v1863_v53 = vsel %vm1843_vm5, %v1830_v3, %v3626_v40  ;;  %v4383_v36 = vld [vmem:[#allocation9_spill] sm:$0xff] }
 0x1a1   : > { %v1913_v19 = vsel %vm1909_vm7, %v1880_v43, %v1400_v62  ;;  %v1896_v62 = vsel %vm1876_vm6, %v1863_v53, %v3663_v0  ;;  %v1749_v58 = vsel %vm368_vm0, %v3080_v13, %v4383_v36 }
 0x1a2   : > { %1539 = vrot.lane.b32.xlu0 %v666_v46, %s2731_s11  ;;  %v1686_v60 = vpop.permute.xlu1 %1685  ;;  %v1946_v61 = vsel %vm1942_vm8, %v1913_v19, %v1528_v10  ;;  %v1782_v43 = vsel %vm1777_vm3, %v1749_v58, %v3244_v33 }
 0x1a3   : > { %v1994_v1 = vsel %vm1975_vm9, %v1961_v42, %v1686_v60  ;;  %v652_v60 = vld [vmem:[#allocation2 + $0x170] sm:$0xff] }
 0x1a4   : > { %v1654_v34 = vpop.permute.xlu0 %1653  ;;  %1697 = vrot.lane.b32.xlu1 %v713_v44, %s2732_s22  ;;  %2617 = vmatprep.mubr.msk.f32.mxu1 %vm2020_vm10, %v1994_v1 }
 0x1a5   : > { %v1978_v37 = vsel %vm1975_vm9, %v1945_v52, %v1654_v34  ;;  %v636_v52 = vld [vmem:[#allocation2 + $0xb0] sm:$0xff] }
 0x1a6   : > { %1665 = vrot.lane.b32.xlu0 %v697_v27, %s2732_s22  ;;  %2593 = vmatprep.mubr.msk.f32.mxu0 %vm2020_vm10, %v1978_v37  ;;  %v3717_v49 = vpop.permute.xlu1 %1273  ;;  %v683_v34 = vld [vmem:[#allocation2 + $0x169] sm:$0xff]  ;;  %v4382_v37 = vld [vmem:[#allocation25_spill] sm:$0xff] }
 0x1a7   : > { %v1765_v7 = vsel %vm368_vm0, %v3176_v55, %v4382_v37  ;;  %v1815_v55 = vsel %vm1810_vm4, %v1782_v43, %v3385_v23  ;;  %v653_v43 = vld [vmem:[#allocation2 + $0x180] sm:$0xff] }
 0x1a8   : > { %v3721_v50 = vpop.permute.xlu0 %1179  ;;  %1191 = vrot.lane.b32.xlu1 %v682_v29, %s2728_s30  ;;  %v1798_v31 = vsel %vm1777_vm3, %v1765_v7, %v3306_v21  ;;  %v1848_v13 = vsel %vm1843_vm5, %v1815_v55, %v3540_v28 }
 0x1a9   : > { %v1831_v30 = vsel %vm1810_vm4, %v1798_v31, %v3471_v51  ;;  %v1881_v33 = vsel %vm1876_vm6, %v1848_v13, %v3717_v49  ;;  %v715_v49 = vld [vmem:[#allocation2 + $0x16a] sm:$0xff] }
 0x1aa   : > { %1159 = vrot.lane.b32.xlu0 %v666_v46, %s2728_s30  ;;  %v1656_v56 = vpop.permute.xlu1 %1655  ;;  %v1929_v46 = vsel %vm1909_vm7, %v1896_v62, %v1432_v48  ;;  %v651_v48 = vld [vmem:[#allocation2 + $0x168] sm:$0xff]  ;;  %v1864_v15 = vsel %vm1843_vm5, %v1831_v30, %v3673_v54 }
 0x1ab   : > { %v1979_v18 = vsel %vm1975_vm9, %v1946_v61, %v1656_v56  ;;  %v1962_v24 = vsel %vm1942_vm8, %v1929_v46, %v1560_v14  ;;  %v635_v14 = vld [vmem:[#allocation2 + $0xa8] sm:$0xff]  ;;  %v668_v56 = vld [vmem:[#allocation2 + $0xb1] sm:$0xff] }
 0x1ac   : > { %v1306_v29 = vpop.permute.xlu0 %1305  ;;  %1317 = vrot.lane.b32.xlu1 %v713_v44, %s2729_s5  ;;  %2594 = vmatmul.mubr.msk.f32.gmra.mrb[2].mxu0 %vm2020_vm10, %v1979_v18  ;;  %v699_v62 = vld [vmem:[#allocation2 + $0xaa] sm:$0xff] }
 0x1ad   : > { %v1897_v21 = vsel %vm1876_vm6, %v1864_v15, %v1306_v29  ;;  %v4384_v46 = vld [vmem:[#allocation23_spill] sm:$0xff]  ;;  %v654_v15 = vld [vmem:[#allocation2 + $0x188] sm:$0xff] }
 0x1ae   : > { %1285 = vrot.lane.b32.xlu0 %v697_v27, %s2729_s5  ;;  %v3745_v10 = vpop.permute.xlu1 %1275  ;;  %v638_v13 = vld [vmem:[#allocation2 + $0xc8] sm:$0xff] }
 0x1b0   : > { %v1688_v35 = vpop.permute.xlu0 %1687  ;;  %1699 = vrot.lane.b32.xlu1 %v714_v57, %s2732_s22 }
 0x1b1   : > { %v1995_v40 = vsel %vm1975_vm9, %v1962_v24, %v1688_v35  ;;  %v2687_v24 = vld [vmem:[#allocation2 + $0x38] sm:$0xff] }
 0x1b2   : > { %1667 = vrot.lane.b32.xlu0 %v698_v32, %s2732_s22  ;;  %2618 = vmatmul.mubr.msk.f32.gmra.mrb[2].mxu1 %vm2020_vm10, %v1995_v40  ;;  %v1402_v0 = vpop.permute.xlu1 %1401  ;;  %v4385_v35 = vld [vmem:[#allocation8_spill] sm:$0xff] }
 0x1b3   : > { %v1914_v23 = vsel %vm1909_vm7, %v1881_v33, %v1402_v0  ;;  %v1750_v40 = vsel %vm368_vm0, %v2687_v24, %v4385_v35  ;;  %v685_v33 = vld [vmem:[#allocation2 + $0x181] sm:$0xff] }
 0x1b4   : > { %v3752_v44 = vpop.permute.xlu0 %1307  ;;  %1319 = vrot.lane.b32.xlu1 %v714_v57, %s2729_s5 }
 0x1b6   : > { %1287 = vrot.lane.b32.xlu0 %v698_v32, %s2729_s5  ;;  %v3756_v11 = vpop.permute.xlu1 %1403  ;;  %v1766_v32 = vsel %vm368_vm0, %v3172_v12, %v4384_v46 }
 0x1b7   : > { %v1799_v0 = vsel %vm1777_vm3, %v1766_v32, %v3304_v2 }
 0x1b8   : > { %v1434_v42 = vpop.permute.xlu0 %1433  ;;  %1445 = vrot.lane.b32.xlu1 %v651_v48, %s2730_s6  ;;  %v4386_v48 = vld [vmem:[#allocation43_spill] sm:$0xff] }
 0x1b9   : > { %v1930_v51 = vsel %vm1909_vm7, %v1897_v21, %v1434_v42  ;;  %v1832_v42 = vsel %vm1810_vm4, %v1799_v0, %v3469_v59  ;;  %v670_v0 = vld [vmem:[#allocation2 + $0xc9] sm:$0xff] }
 0x1ba   : > { %1413 = vrot.lane.b32.xlu0 %v635_v14, %s2730_s6  ;;  %v1530_v27 = vpop.permute.xlu1 %1529  ;;  %v1783_v14 = vsel %vm1777_vm3, %v1750_v40, %v4386_v48 }
 0x1bb   : > { %v1947_v28 = vsel %vm1942_vm8, %v1914_v23, %v1530_v27  ;;  %v1816_v12 = vsel %vm1810_vm4, %v1783_v14, %v3383_v4  ;;  %v1865_v27 = vsel %vm1843_vm5, %v1832_v42, %v3721_v50 }
 0x1bc   : > { %v1436_v1 = vpop.permute.xlu0 %1435  ;;  %1447 = vrot.lane.b32.xlu1 %v652_v60, %s2730_s6  ;;  %v1898_v2 = vsel %vm1876_vm6, %v1865_v27, %v3752_v44  ;;  %v701_v27 = vld [vmem:[#allocation2 + $0xc2] sm:$0xff] }
 0x1bd   : > { %v1931_v59 = vsel %vm1909_vm7, %v1898_v2, %v1436_v1  ;;  %v700_v1 = vld [vmem:[#allocation2 + $0xb2] sm:$0xff] }
 0x1be   : > { %1415 = vrot.lane.b32.xlu0 %v636_v52, %s2730_s6  ;;  %v3762_v22 = vpop.permute.xlu1 %1181  ;;  %v4389_v2 = vld [vmem:[#allocation27_spill] sm:$0xff] }
 0x1c0   : > { %v1562_v41 = vpop.permute.xlu0 %1561  ;;  %1573 = vrot.lane.b32.xlu1 %v683_v34, %s2731_s11 }
 0x1c1   : > { %v1963_v54 = vsel %vm1942_vm8, %v1930_v51, %v1562_v41 }
 0x1c2   : > { %1541 = vrot.lane.b32.xlu0 %v667_v9, %s2731_s11  ;;  %v1564_v38 = vpop.permute.xlu1 %1563 }
 0x1c3   : > { %v1964_v50 = vsel %vm1942_vm8, %v1931_v59, %v1564_v38  ;;  %v637_v38 = vld [vmem:[#allocation2 + $0xc0] sm:$0xff]  ;;  %v2690_v59 = vld [vmem:[#allocation2 + $0x50] sm:$0xff] }
 0x1c4   : > { %v1532_v19 = vpop.permute.xlu0 %1531  ;;  %1193 = vrot.lane.b32.xlu1 %v683_v34, %s2728_s30  ;;  %v1849_v34 = vsel %vm1843_vm5, %v1816_v12, %v3538_v20 }
 0x1c6   : > { %1161 = vrot.lane.b32.xlu0 %v667_v9, %s2728_s30  ;;  %v1690_v61 = vpop.permute.xlu1 %1689  ;;  %v1882_v9 = vsel %vm1876_vm6, %v1849_v34, %v3745_v10  ;;  %v716_v10 = vld [vmem:[#allocation2 + $0x172] sm:$0xff] }
 0x1c7   : > { %v1996_v3 = vsel %vm1975_vm9, %v1963_v54, %v1690_v61  ;;  %v1915_v4 = vsel %vm1909_vm7, %v1882_v9, %v3756_v11  ;;  %v4387_v54 = vld [vmem:[#allocation29_spill] sm:$0xff]  ;;  %v2689_v34 = vld [vmem:[#allocation2 + $0x110] sm:$0xff] }
 0x1c8   : > { %v1658_v18 = vpop.permute.xlu0 %1657  ;;  %1575 = vrot.lane.b32.xlu1 %v684_v5, %s2731_s11  ;;  %2620 = vmatprep.mubr.msk.f32.mxu1 %vm2020_vm10, %v1996_v3  ;;  %v1948_v20 = vsel %vm1942_vm8, %v1915_v4, %v1532_v19  ;;  %v1767_v61 = vsel %vm368_vm0, %v3188_v8, %v4387_v54  ;;  %v1768_v9 = vsel %vm368_vm0, %v2689_v34, %v4389_v2  ;;  %v4390_v4 = vld [vmem:[#allocation10_spill] sm:$0xff]  ;;  %v4397_v34 = vld [vmem:[#allocation57_spill] sm:$0xff] }
 0x1c9   : > { %v1980_v29 = vsel %vm1975_vm9, %v1947_v28, %v1658_v18  ;;  %v4388_v28 = vld [vmem:[#allocation12_spill] sm:$0xff]  ;;  %v1800_v18 = vsel %vm1777_vm3, %v1767_v61, %v3320_v39 }
 0x1ca   : > { %1543 = vrot.lane.b32.xlu0 %v668_v56, %s2731_s11  ;;  %2596 = vmatprep.mubr.msk.f32.mxu0 %vm2020_vm10, %v1980_v29  ;;  %v3799_v53 = vpop.permute.xlu1 %1183  ;;  %v655_v61 = vld [vmem:[#allocation2 + $0x198] sm:$0xff] }
 0x1cc   : > { %v3801_v57 = vpop.permute.xlu0 %1151  ;;  %1701 = vrot.lane.b32.xlu1 %v715_v49, %s2732_s22 }
 0x1ce   : > { %1669 = vrot.lane.b32.xlu0 %v699_v62, %s2732_s22  ;;  %v1310_v60 = vpop.permute.xlu1 %1309 }
 0x1d0   : > { %v1278_v52 = vpop.permute.xlu0 %1277  ;;  %1195 = vrot.lane.b32.xlu1 %v684_v5, %s2728_s30  ;;  %v669_v5 = vld [vmem:[#allocation2 + $0xc1] sm:$0xff] }
 0x1d2   : > { %1163 = vrot.lane.b32.xlu0 %v668_v56, %s2728_s30  ;;  %v1692_v41 = vpop.permute.xlu1 %1691  ;;  %v2688_v56 = vld [vmem:[#allocation2 + $0x48] sm:$0xff] }
 0x1d3   : > { %v1997_v37 = vsel %vm1975_vm9, %v1964_v50, %v1692_v41  ;;  %v1751_v3 = vsel %vm368_vm0, %v2688_v56, %v4388_v28  ;;  %v1752_v50 = vsel %vm368_vm0, %v2690_v59, %v4390_v4  ;;  %v4391_v41 = vld [vmem:[#allocation49_spill] sm:$0xff]  ;;  %v639_v28 = vld [vmem:[#allocation2 + $0xd8] sm:$0xff] }
 0x1d4   : > { %v1660_v44 = vpop.permute.xlu0 %1659  ;;  %1321 = vrot.lane.b32.xlu1 %v715_v49, %s2729_s5  ;;  %2621 = vmatmul.mubr.msk.f32.gmra.mrb[4].mxu1 %vm2020_vm10, %v1997_v37  ;;  %v1784_v29 = vsel %vm1777_vm3, %v1751_v3, %v3250_v63  ;;  %v1833_v49 = vsel %vm1810_vm4, %v1800_v18, %v3479_v26  ;;  %v686_v26 = vld [vmem:[#allocation2 + $0x189] sm:$0xff]  ;;  %v4392_v37 = vld [vmem:[#allocation44_spill] sm:$0xff]  ;;  %v656_v18 = vld [vmem:[#allocation2 + $0x1a0] sm:$0xff] }
 0x1d5   : > { %v1981_v7 = vsel %vm1975_vm9, %v1948_v20, %v1660_v44  ;;  %v1817_v8 = vsel %vm1810_vm4, %v1784_v29, %v3393_v16  ;;  %v1866_v46 = vsel %vm1843_vm5, %v1833_v49, %v3762_v22  ;;  %v1801_v20 = vsel %vm1777_vm3, %v1768_v9, %v4391_v41  ;;  %v640_v49 = vld [vmem:[#allocation2 + $0xe0] sm:$0xff] }
 0x1d6   : > { %1289 = vrot.lane.b32.xlu0 %v699_v62, %s2729_s5  ;;  %2597 = vmatmul.mubr.msk.f32.gmra.mrb[4].mxu0 %vm2020_vm10, %v1981_v7  ;;  %v3839_v11 = vpop.permute.xlu1 %1311  ;;  %v1850_v24 = vsel %vm1843_vm5, %v1817_v8, %v3546_v25  ;;  %v1899_v39 = vsel %vm1876_vm6, %v1866_v46, %v1310_v60  ;;  %v717_v60 = vld [vmem:[#allocation2 + $0x182] sm:$0xff]  ;;  %v1785_v44 = vsel %vm1777_vm3, %v1752_v50, %v4392_v37  ;;  %v687_v8 = vld [vmem:[#allocation2 + $0x199] sm:$0xff] }
 0x1d7   : > { %v1883_v63 = vsel %vm1876_vm6, %v1850_v24, %v1278_v52  ;;  %v1834_v7 = vsel %vm1810_vm4, %v1801_v20, %v3477_v6  ;;  %v719_v20 = vld [vmem:[#allocation2 + $0x19a] sm:$0xff] }
 0x1d8   : > { %v3841_v36 = vpop.permute.xlu0 %1279  ;;  %1703 = vrot.lane.b32.xlu1 %v716_v10, %s2732_s22 }
 0x1da   : > { %1671 = vrot.lane.b32.xlu0 %v700_v1, %s2732_s22  ;;  %v1438_v58 = vpop.permute.xlu1 %1437 }
 0x1db   : > { %v1932_v35 = vsel %vm1909_vm7, %v1899_v39, %v1438_v58  ;;  %v1867_v58 = vsel %vm1843_vm5, %v1834_v7, %v3799_v53  ;;  %v2691_v39 = vld [vmem:[#allocation2 + $0x120] sm:$0xff] }
 0x1dc   : > { %v1406_v31 = vpop.permute.xlu0 %1405  ;;  %1323 = vrot.lane.b32.xlu1 %v716_v10, %s2729_s5  ;;  %v703_v7 = vld [vmem:[#allocation2 + $0xda] sm:$0xff] }
 0x1dd   : > { %v1916_v16 = vsel %vm1909_vm7, %v1883_v63, %v1406_v31  ;;  %v4393_v63 = vld [vmem:[#allocation32_spill] sm:$0xff] }
 0x1de   : > { %1291 = vrot.lane.b32.xlu0 %v700_v1, %s2729_s5  ;;  %v3847_v30 = vpop.permute.xlu1 %1439  ;;  %v1818_v1 = vsel %vm1810_vm4, %v1785_v44, %v3391_v45 }
 0x1e0   : > { %v3849_v55 = vpop.permute.xlu0 %1407  ;;  %1449 = vrot.lane.b32.xlu1 %v653_v43, %s2730_s6  ;;  %v1851_v43 = vsel %vm1843_vm5, %v1818_v1, %v3801_v57 }
 0x1e1   : > { %v1884_v6 = vsel %vm1876_vm6, %v1851_v43, %v3841_v36  ;;  %v718_v36 = vld [vmem:[#allocation2 + $0x18a] sm:$0xff] }
 0x1e2   : > { %1417 = vrot.lane.b32.xlu0 %v637_v38, %s2730_s6  ;;  %v1566_v19 = vpop.permute.xlu1 %1565  ;;  %v1900_v38 = vsel %vm1876_vm6, %v1867_v58, %v3839_v11  ;;  %v1917_v45 = vsel %vm1909_vm7, %v1884_v6, %v3849_v55  ;;  %v702_v55 = vld [vmem:[#allocation2 + $0xca] sm:$0xff] }
 0x1e3   : > { %v1965_v40 = vsel %vm1942_vm8, %v1932_v35, %v1566_v19  ;;  %v1769_v35 = vsel %vm368_vm0, %v2691_v39, %v4393_v63 }
 0x1e4   : > { %v1534_v21 = vpop.permute.xlu0 %1533  ;;  %1451 = vrot.lane.b32.xlu1 %v654_v15, %s2730_s6  ;;  %v1933_v15 = vsel %vm1909_vm7, %v1900_v38, %v3847_v30  ;;  %v704_v38 = vld [vmem:[#allocation2 + $0xe2] sm:$0xff] }
 0x1e5   : > { %v1949_v48 = vsel %vm1942_vm8, %v1916_v16, %v1534_v21  ;;  %v4394_v16 = vld [vmem:[#allocation15_spill] sm:$0xff] }
 0x1e6   : > { %1419 = vrot.lane.b32.xlu0 %v638_v13, %s2730_s6  ;;  %v3855_v51 = vpop.permute.xlu1 %1185 }
 0x1e8   : > { %v3857_v23 = vpop.permute.xlu0 %1153  ;;  %1577 = vrot.lane.b32.xlu1 %v685_v33, %s2731_s11 }
 0x1ea   : > { %1545 = vrot.lane.b32.xlu0 %v669_v5, %s2731_s11  ;;  %v1568_v62 = vpop.permute.xlu1 %1567 }
 0x1eb   : > { %v1966_v53 = vsel %vm1942_vm8, %v1933_v15, %v1568_v62  ;;  %v2693_v15 = vld [vmem:[#allocation2 + $0x128] sm:$0xff] }
 0x1ec   : > { %v1536_v32 = vpop.permute.xlu0 %1535  ;;  %1197 = vrot.lane.b32.xlu1 %v685_v33, %s2728_s30 }
 0x1ed   : > { %v1950_v57 = vsel %vm1942_vm8, %v1917_v45, %v1536_v32  ;;  %v671_v32 = vld [vmem:[#allocation2 + $0xd9] sm:$0xff]  ;;  %v4398_v45 = vld [vmem:[#allocation31_spill] sm:$0xff] }
 0x1ee   : > { %1165 = vrot.lane.b32.xlu0 %v669_v5, %s2728_s30  ;;  %v1694_v22 = vpop.permute.xlu1 %1693 }
 0x1ef   : > { %v1998_v25 = vsel %vm1975_vm9, %v1965_v40, %v1694_v22  ;;  %v4395_v22 = vld [vmem:[#allocation51_spill] sm:$0xff] }
 0x1f0   : > { %v1662_v14 = vpop.permute.xlu0 %1661  ;;  %1579 = vrot.lane.b32.xlu1 %v686_v26, %s2731_s11  ;;  %2623 = vmatprep.mubr.msk.f32.mxu1 %vm2020_vm10, %v1998_v25  ;;  %v4396_v25 = vld [vmem:[#allocation46_spill] sm:$0xff] }
 0x1f1   : > { %v1982_v42 = vsel %vm1975_vm9, %v1949_v48, %v1662_v14  ;;  %v688_v48 = vld [vmem:[#allocation2 + $0x1a1] sm:$0xff] }
 0x1f2   : > { %1547 = vrot.lane.b32.xlu0 %v670_v0, %s2731_s11  ;;  %2599 = vmatprep.mubr.msk.f32.mxu0 %vm2020_vm10, %v1982_v42  ;;  %v3892_v12 = vpop.permute.xlu1 %1187 }
 0x1f4   : > { %v3894_v52 = vpop.permute.xlu0 %1155  ;;  %1705 = vrot.lane.b32.xlu1 %v717_v60, %s2732_s22 }
 0x1f6   : > { %1673 = vrot.lane.b32.xlu0 %v701_v27, %s2732_s22  ;;  %v3908_v10 = vpop.permute.xlu1 %1313 }
 0x1f8   : > { %v3914_v31 = vpop.permute.xlu0 %1281  ;;  %1199 = vrot.lane.b32.xlu1 %v686_v26, %s2728_s30  ;;  %v2692_v26 = vld [vmem:[#allocation2 + $0x60] sm:$0xff] }
 0x1f9   : > { %v1753_v40 = vsel %vm368_vm0, %v2692_v26, %v4394_v16 }
 0x1fa   : > { %1167 = vrot.lane.b32.xlu0 %v670_v0, %s2728_s30  ;;  %v1696_v19 = vpop.permute.xlu1 %1695  ;;  %v1802_v0 = vsel %vm1777_vm3, %v1769_v35, %v4395_v22  ;;  %v1786_v14 = vsel %vm1777_vm3, %v1753_v40, %v4396_v25 }
 0x1fb   : > { %v1999_v11 = vsel %vm1975_vm9, %v1966_v53, %v1696_v19  ;;  %v1835_v42 = vsel %vm1810_vm4, %v1802_v0, %v3487_v17  ;;  %v1819_v2 = vsel %vm1810_vm4, %v1786_v14, %v4397_v34  ;;  %v1770_v53 = vsel %vm368_vm0, %v2693_v15, %v4398_v45  ;;  %v2694_v19 = vld [vmem:[#allocation2 + $0x68] sm:$0xff]  ;;  %v2695_v14 = vld [vmem:[#allocation2 + $0x138] sm:$0xff]  ;;  %v4404_v34 = vld [vmem:[#allocation17_spill] sm:$0xff] }
 0x1fc   : > { %v1664_v13 = vpop.permute.xlu0 %1663  ;;  %1325 = vrot.lane.b32.xlu1 %v717_v60, %s2729_s5  ;;  %2624 = vmatmul.mubr.msk.f32.gmra.mrb[6].mxu1 %vm2020_vm10, %v1999_v11  ;;  %v1868_v9 = vsel %vm1843_vm5, %v1835_v42, %v3855_v51  ;;  %v1852_v4 = vsel %vm1843_vm5, %v1819_v2, %v3857_v23  ;;  %v4403_v42 = vld [vmem:[#allocation34_spill] sm:$0xff] }
 0x1fd   : > { %v1983_v21 = vsel %vm1975_vm9, %v1950_v57, %v1664_v13  ;;  %v1901_v50 = vsel %vm1876_vm6, %v1868_v9, %v3908_v10  ;;  %v1885_v17 = vsel %vm1876_vm6, %v1852_v4, %v3914_v31  ;;  %v720_v31 = vld [vmem:[#allocation2 + $0x1a2] sm:$0xff]  ;;  %v4406_v4 = vld [vmem:[#allocation48_spill] sm:$0xff] }
 0x1fe   : > { %1293 = vrot.lane.b32.xlu0 %v701_v27, %s2729_s5  ;;  %2600 = vmatmul.mubr.msk.f32.gmra.mrb[6].mxu0 %vm2020_vm10, %v1983_v21  ;;  %v3936_v30 = vpop.permute.xlu1 %1315  ;;  %v672_v27 = vld [vmem:[#allocation2 + $0xe1] sm:$0xff] }
 0x1ff   : > { %v4399_v57 = vld [vmem:[#allocation14_spill] sm:$0xff]  ;;  %v4405_v9 = vld [vmem:[#allocation53_spill] sm:$0xff] }
 0x200   : > { %v3938_v33 = vpop.permute.xlu0 %1283  ;;  %1707 = vrot.lane.b32.xlu1 %v718_v36, %s2732_s22  ;;  %v1754_v11 = vsel %vm368_vm0, %v2694_v19, %v4399_v57  ;;  %v4400_v13 = vld [vmem:[#allocation50_spill] sm:$0xff] }
 0x201   : > { %v1803_v21 = vsel %vm1777_vm3, %v1770_v53, %v4400_v13  ;;  %v4409_v13 = vld [vmem:[#allocation33_spill] sm:$0xff] }
 0x202   : > { %1675 = vrot.lane.b32.xlu0 %v702_v55, %s2732_s22  ;;  %v1442_v5 = vpop.permute.xlu1 %1441 }
 0x203   : > { %v1934_v41 = vsel %vm1909_vm7, %v1901_v50, %v1442_v5  ;;  %v1836_v5 = vsel %vm1810_vm4, %v1803_v21, %v3485_v47 }
 0x204   : > { %v1410_v54 = vpop.permute.xlu0 %1409  ;;  %1327 = vrot.lane.b32.xlu1 %v718_v36, %s2729_s5  ;;  %v4401_v36 = vld [vmem:[#allocation45_spill] sm:$0xff] }
 0x205   : > { %v1918_v37 = vsel %vm1909_vm7, %v1885_v17, %v1410_v54  ;;  %v4407_v17 = vld [vmem:[#allocation65_spill] sm:$0xff] }
 0x206   : > { %1295 = vrot.lane.b32.xlu0 %v702_v55, %s2729_s5  ;;  %v3944_v56 = vpop.permute.xlu1 %1443  ;;  %v1787_v55 = vsel %vm1777_vm3, %v1754_v11, %v4401_v36  ;;  %v2697_v11 = vld [vmem:[#allocation2 + $0x140] sm:$0xff] }
 0x207   : > { %v1772_v21 = vsel %vm368_vm0, %v2697_v11, %v4409_v13  ;;  %v2698_v36 = vld [vmem:[#allocation2 + $0x80] sm:$0xff] }
 0x208   : > { %v3946_v3 = vpop.permute.xlu0 %1411  ;;  %1453 = vrot.lane.b32.xlu1 %v655_v61, %s2730_s6  ;;  %v4402_v61 = vld [vmem:[#allocation56_spill] sm:$0xff] }
 0x20a   : > { %1421 = vrot.lane.b32.xlu0 %v639_v28, %s2730_s6  ;;  %v1570_v29 = vpop.permute.xlu1 %1569  ;;  %v1820_v28 = vsel %vm1810_vm4, %v1787_v55, %v4402_v61  ;;  %v4410_v55 = vld [vmem:[#allocation16_spill] sm:$0xff] }
 0x20b   : > { %v1967_v51 = vsel %vm1942_vm8, %v1934_v41, %v1570_v29 }
 0x20c   : > { %v1538_v62 = vpop.permute.xlu0 %1537  ;;  %1455 = vrot.lane.b32.xlu1 %v656_v18, %s2730_s6  ;;  %v1869_v18 = vsel %vm1843_vm5, %v1836_v5, %v3892_v12  ;;  %v1756_v5 = vsel %vm368_vm0, %v2698_v36, %v4410_v55 }
 0x20d   : > { %v1951_v23 = vsel %vm1942_vm8, %v1918_v37, %v1538_v62  ;;  %v1902_v62 = vsel %vm1876_vm6, %v1869_v18, %v3936_v30  ;;  %v4408_v37 = vld [vmem:[#allocation59_spill] sm:$0xff] }
 0x20e   : > { %1423 = vrot.lane.b32.xlu0 %v640_v49, %s2730_s6  ;;  %v3952_v46 = vpop.permute.xlu1 %1189  ;;  %v1853_v49 = vsel %vm1843_vm5, %v1820_v28, %v3894_v52  ;;  %v1935_v47 = vsel %vm1909_vm7, %v1902_v62, %v3944_v56  ;;  %v4412_v28 = vld [vmem:[#allocation47_spill] sm:$0xff] }
 0x20f   : > { %v1789_v18 = vsel %vm1777_vm3, %v1756_v5, %v4412_v28 }
 0x210   : > { %v3954_v24 = vpop.permute.xlu0 %1157  ;;  %1581 = vrot.lane.b32.xlu1 %v687_v8, %s2731_s11  ;;  %v1886_v8 = vsel %vm1876_vm6, %v1853_v49, %v3938_v33 }
 0x212   : > { %1549 = vrot.lane.b32.xlu0 %v671_v32, %s2731_s11  ;;  %v1572_v60 = vpop.permute.xlu1 %1571  ;;  %v1919_v32 = vsel %vm1909_vm7, %v1886_v8, %v3946_v3  ;;  %v4414_v8 = vld [vmem:[#allocation58_spill] sm:$0xff] }
 0x213   : > { %v1968_v39 = vsel %vm1942_vm8, %v1935_v47, %v1572_v60  ;;  %v1771_v60 = vsel %vm368_vm0, %v2695_v14, %v4403_v42  ;;  %v1822_v47 = vsel %vm1810_vm4, %v1789_v18, %v4414_v8  ;;  %v2700_v18 = vld [vmem:[#allocation2 + $0x158] sm:$0xff] }
 0x214   : > { %v1540_v59 = vpop.permute.xlu0 %1539  ;;  %1583 = vrot.lane.b32.xlu1 %v688_v48, %s2731_s11 }
 0x215   : > { %v1952_v12 = vsel %vm1942_vm8, %v1919_v32, %v1540_v59  ;;  %v1804_v59 = vsel %vm1777_vm3, %v1771_v60, %v4405_v9  ;;  %v4090_v60 = vld [vmem:[%s4281_s3] ss:$0 sm:$0xff] }
 0x216   : > { %1551 = vrot.lane.b32.xlu0 %v672_v27, %s2731_s11  ;;  %v1698_v44 = vpop.permute.xlu1 %1697  ;;  %v2696_v27 = vld [vmem:[#allocation2 + $0x78] sm:$0xff]  ;;  %v1837_v41 = vsel %vm1810_vm4, %v1804_v59, %v4407_v17 }
 0x217   : > { %v2000_v10 = vsel %vm1975_vm9, %v1967_v51, %v1698_v44  ;;  %v1755_v2 = vsel %vm368_vm0, %v2696_v27, %v4404_v34  ;;  %v1870_v44 = vsel %vm1843_vm5, %v1837_v41, %v3952_v46  ;;  %v2699_v41 = vld [vmem:[#allocation2 + $0x150] sm:$0xff] }
 0x218   : > { %v1666_v1 = vpop.permute.xlu0 %1665  ;;  %1709 = vrot.lane.b32.xlu1 %v719_v20, %s2732_s22  ;;  %2626 = vmatprep.mubr.msk.f32.mxu1 %vm2020_vm10, %v2000_v10  ;;  %v1788_v50 = vsel %vm1777_vm3, %v1755_v2, %v4406_v4 }
 0x219   : > { %v1984_v58 = vsel %vm1975_vm9, %v1951_v23, %v1666_v1  ;;  %v1821_v51 = vsel %vm1810_vm4, %v1788_v50, %v4408_v37 }
 0x21a   : > { %1677 = vrot.lane.b32.xlu0 %v703_v7, %s2732_s22  ;;  %2602 = vmatprep.mubr.msk.f32.mxu0 %vm2020_vm10, %v1984_v58  ;;  %v3990_v43 = vpop.permute.xlu1 %1191  ;;  %v1854_v23 = vsel %vm1843_vm5, %v1821_v51, %v3954_v24 }
 0x21c   : > { %v3992_v6 = vpop.permute.xlu0 %1159  ;;  %1711 = vrot.lane.b32.xlu1 %v720_v31, %s2732_s22 }
 0x21e   : > { %1679 = vrot.lane.b32.xlu0 %v704_v38, %s2732_s22  ;;  %v1318_v54 = vpop.permute.xlu1 %1317 }
 0x21f   : > { %v1903_v10 = vsel %vm1876_vm6, %v1870_v44, %v1318_v54  ;;  %v4411_v54 = vld [vmem:[#allocation52_spill] sm:$0xff]  ;;  %v4416_v44 = vld [vmem:[#allocation55_spill] sm:$0xff] }
 0x220   : > { %v1286_v29 = vpop.permute.xlu0 %1285  ;;  %v1805_v61 = vsel %vm1777_vm3, %v1772_v21, %v4411_v54 }
 0x221   : > { %v1887_v1 = vsel %vm1876_vm6, %v1854_v23, %v1286_v29  ;;  %v4413_v29 = vld [vmem:[#allocation64_spill] sm:$0xff] }
 0x222   : > { %v1700_v63 = vpop.permute.xlu1 %1699  ;;  %v1838_v49 = vsel %vm1810_vm4, %v1805_v61, %v4413_v29  ;;  %v4419_v29 = vld [vmem:[#allocation35_spill] sm:$0xff] }
 0x223   : > { %v2001_v35 = vsel %vm1975_vm9, %v1968_v39, %v1700_v63  ;;  %v1871_v32 = vsel %vm1843_vm5, %v1838_v49, %v3990_v43  ;;  %v1855_v63 = vsel %vm1843_vm5, %v1822_v47, %v3992_v6  ;;  %v1774_v49 = vsel %vm368_vm0, %v2700_v18, %v4419_v29  ;;  %v4421_v47 = vld [vmem:[#allocation66_spill] sm:$0xff] }
 0x224   : > { %v1668_v52 = vpop.permute.xlu0 %1667  ;;  %2627 = vmatmul.mubr.msk.f32.gmra.mrb[8].mxu1 %vm2020_vm10, %v2001_v35 }
 0x225   : > { %v1985_v26 = vsel %vm1975_vm9, %v1952_v12, %v1668_v52 }
 0x226   : > { %2603 = vmatmul.mubr.msk.f32.gmra.mrb[8].mxu0 %vm2020_vm10, %v1985_v26  ;;  %v1320_v30 = vpop.permute.xlu1 %1319 }
 0x227   : > { %v1904_v12 = vsel %vm1876_vm6, %v1871_v32, %v1320_v30 }
 0x228   : > { %v1288_v33 = vpop.permute.xlu0 %1287 }
 0x229   : > { %v1888_v35 = vsel %vm1876_vm6, %v1855_v63, %v1288_v33 }
 0x22a   : > { %v1446_v56 = vpop.permute.xlu1 %1445 }
 0x22b   : > { %v1936_v58 = vsel %vm1909_vm7, %v1903_v10, %v1446_v56 }
 0x22c   : > { %v1414_v16 = vpop.permute.xlu0 %1413 }
 0x22d   : > { %v1920_v31 = vsel %vm1909_vm7, %v1887_v1, %v1414_v16  ;;  %v4417_v1 = vld [vmem:[#allocation67_spill] sm:$0xff] }
 0x22e   : > { %v1448_v40 = vpop.permute.xlu1 %1447 }
 0x22f   : > { %v1937_v52 = vsel %vm1909_vm7, %v1904_v12, %v1448_v40 }
 0x230   : > { %v1416_v3 = vpop.permute.xlu0 %1415 }
 0x231   : > { %v1921_v26 = vsel %vm1909_vm7, %v1888_v35, %v1416_v3  ;;  %v4422_v35 = vld [vmem:[#allocation60_spill] sm:$0xff] }
 0x232   : > { %v1574_v22 = vpop.permute.xlu1 %1573 }
 0x233   : > { %v1969_v38 = vsel %vm1942_vm8, %v1936_v58, %v1574_v22 }
 0x234   : > { %v1542_v0 = vpop.permute.xlu0 %1541 }
 0x235   : > { %v1953_v45 = vsel %vm1942_vm8, %v1920_v31, %v1542_v0 }
 0x236   : > { %v4026_v48 = vpop.permute.xlu1 %1193 }
 0x238   : > { %v4028_v25 = vpop.permute.xlu0 %1161 }
 0x23a   : > { %v1576_v20 = vpop.permute.xlu1 %1575 }
 0x23b   : > { %v1970_v56 = vsel %vm1942_vm8, %v1937_v52, %v1576_v20  ;;  %v4415_v20 = vld [vmem:[#allocation36_spill] sm:$0xff] }
 0x23c   : > { %v1544_v7 = vpop.permute.xlu0 %1543  ;;  %v1773_v37 = vsel %vm368_vm0, %v2699_v41, %v4415_v20 }
 0x23d   : > { %v1954_v22 = vsel %vm1942_vm8, %v1921_v26, %v1544_v7  ;;  %v1806_v7 = vsel %vm1777_vm3, %v1773_v37, %v4416_v44 }
 0x23e   : > { %v1702_v15 = vpop.permute.xlu1 %1701  ;;  %v1839_v58 = vsel %vm1810_vm4, %v1806_v7, %v4417_v1 }
 0x23f   : > { %v2002_v53 = vsel %vm1975_vm9, %v1969_v38, %v1702_v15  ;;  %v1872_v15 = vsel %vm1843_vm5, %v1839_v58, %v4026_v48  ;;  %v4424_v58 = vld [vmem:[#allocation63_spill] sm:$0xff] }
 0x240   : > { %v1670_v46 = vpop.permute.xlu0 %1669  ;;  %2629 = vmatprep.mubr.msk.f32.mxu1 %vm2020_vm10, %v2002_v53  ;;  %v4418_v53 = vld [vmem:[#allocation61_spill] sm:$0xff] }
 0x241   : > { %v1986_v19 = vsel %vm1975_vm9, %v1953_v45, %v1670_v46  ;;  %v1856_v46 = vsel %vm1843_vm5, %v4418_v53, %v4028_v25 }
 0x242   : > { %2605 = vmatprep.mubr.msk.f32.mxu0 %vm2020_vm10, %v1986_v19  ;;  %v4056_v24 = vpop.permute.xlu1 %1195 }
 0x244   : > { %v4058_v57 = vpop.permute.xlu0 %1163 }
 0x245   : > { %v1857_v52 = vsel %vm1843_vm5, %v4422_v35, %v4058_v57 }
 0x246   : > { %v1322_v62 = vpop.permute.xlu1 %1321 }
 0x247   : > { %v1905_v19 = vsel %vm1876_vm6, %v1872_v15, %v1322_v62  ;;  %v4420_v62 = vld [vmem:[#allocation54_spill] sm:$0xff] }
 0x248   : > { %v1290_v39 = vpop.permute.xlu0 %1289  ;;  %v1807_v8 = vsel %vm1777_vm3, %v1774_v49, %v4420_v62 }
 0x249   : > { %v1889_v11 = vsel %vm1876_vm6, %v1856_v46, %v1290_v39  ;;  %v1840_v32 = vsel %vm1810_vm4, %v1807_v8, %v4421_v47 }
 0x24a   : > { %v1704_v16 = vpop.permute.xlu1 %1703  ;;  %v1873_v63 = vsel %vm1843_vm5, %v1840_v32, %v4056_v24 }
 0x24b   : > { %v2003_v43 = vsel %vm1975_vm9, %v1970_v56, %v1704_v16 }
 0x24c   : > { %v1672_v0 = vpop.permute.xlu0 %1671  ;;  %2630 = vmatmul.mubr.msk.f32.gmra.mrb[10].mxu1 %vm2020_vm10, %v2003_v43 }
 0x24d   : > { %v1987_v14 = vsel %vm1975_vm9, %v1954_v22, %v1672_v0 }
 0x24e   : > { %2606 = vmatmul.mubr.msk.f32.gmra.mrb[10].mxu0 %vm2020_vm10, %v1987_v14  ;;  %v1324_v6 = vpop.permute.xlu1 %1323 }
 0x24f   : > { %v1906_v26 = vsel %vm1876_vm6, %v1873_v63, %v1324_v6 }
 0x250   : > { %v1292_v30 = vpop.permute.xlu0 %1291 }
 0x251   : > { %v1890_v56 = vsel %vm1876_vm6, %v1857_v52, %v1292_v30 }
 0x252   : > { %v1450_v33 = vpop.permute.xlu1 %1449 }
 0x253   : > { %v1938_v13 = vsel %vm1909_vm7, %v1905_v19, %v1450_v33  ;;  %v4425_v19 = vld [vmem:[#allocation68_spill] sm:$0xff] }
 0x254   : > { %v1418_v40 = vpop.permute.xlu0 %1417 }
 0x255   : > { %v1922_v21 = vsel %vm1909_vm7, %v1889_v11, %v1418_v40 }
 0x256   : > { %v1452_v42 = vpop.permute.xlu1 %1451 }
 0x257   : > { %v1939_v16 = vsel %vm1909_vm7, %v1906_v26, %v1452_v42 }
 0x258   : > { %v1420_v3 = vpop.permute.xlu0 %1419 }
 0x259   : > { %v1923_v22 = vsel %vm1909_vm7, %v1890_v56, %v1420_v3 }
 0x25a   : > { %v1578_v27 = vpop.permute.xlu1 %1577 }
 0x25b   : > { %v2592_v2 = vpop.f32.mrb[0].mxu0  ;;  %v1971_v36 = vsel %vm1942_vm8, %v1938_v13, %v1578_v27 }
 0x25c   : > { %v1546_v34 = vpop.permute.xlu0 %1545  ;;  %v2193_v9 = vadd.f32 %v2592_v2, %v4090_v60  ;;  %v2187_v59 = vpop.f32.mrb[1].mxu0 }
 0x25d   : > { %v2188_v4 = vadd.f32 %v4090_v60, %v2187_v59  ;;  %v1955_v55 = vsel %vm1942_vm8, %v1922_v21, %v1546_v34 }
 0x25e   : > { %2347 = vst.msk [vmem:[%s4095_s28 + $0x8] sm:$0xff] %vm1777_vm3, %v2193_v9  ;;  %v4101_v50 = vpop.permute.xlu1 %1197 }
 0x25f   : > { %2346 = vst.msk [vmem:[%s4095_s28] sm:$0xff] %vm1777_vm3, %v2188_v4 }
 0x260   : > { %v4105_v17 = vpop.permute.xlu0 %1165 }
 0x261   : > { %v2616_v51 = vpop.f32.mrb[0].mxu1 }
 0x262   : > { %v2273_v23 = vadd.f32 %v2616_v51, %v4090_v60  ;;  %v2267_v10 = vpop.f32.mrb[1].mxu1  ;;  %v1580_v38 = vpop.permute.xlu1 %1579 }
 0x263   : > { %v2268_v31 = vadd.f32 %v4090_v60, %v2267_v10  ;;  %v1972_v43 = vsel %vm1942_vm8, %v1939_v16, %v1580_v38 }
 0x264   : > { %2363 = vst.msk [vmem:[%s4095_s28 + $0x88] sm:$0xff] %vm1777_vm3, %v2273_v23  ;;  %v1548_v45 = vpop.permute.xlu0 %1547  ;;  %v4423_v23 = vld [vmem:[#allocation69_spill] sm:$0xff] }
 0x265   : > { %2362 = vst.msk [vmem:[%s4095_s28 + $0x80] sm:$0xff] %vm1777_vm3, %v2268_v31  ;;  %v1956_v14 = vsel %vm1942_vm8, %v1923_v22, %v1548_v45  ;;  %v1874_v10 = vsel %vm1843_vm5, %v4423_v23, %v4101_v50  ;;  %v1858_v31 = vsel %vm1843_vm5, %v4424_v58, %v4105_v17 }
 0x266   : > { %v1706_v48 = vpop.permute.xlu1 %1705 }
 0x267   : > { %v2004_v5 = vsel %vm1975_vm9, %v1971_v36, %v1706_v48  ;;  %v4426_v36 = vld [vmem:[#allocation62_spill] sm:$0xff] }
 0x268   : > { %v1674_v54 = vpop.permute.xlu0 %1673  ;;  %2632 = vmatprep.mubr.msk.f32.mxu1 %vm2020_vm10, %v2004_v5 }
 0x269   : > { %v1988_v25 = vsel %vm1975_vm9, %v1955_v55, %v1674_v54 }
 0x26a   : > { %2608 = vmatprep.mubr.msk.f32.mxu0 %vm2020_vm10, %v1988_v25  ;;  %v1200_v61 = vpop.permute.xlu1 %1199 }
 0x26b   : > { %v1875_v11 = vsel %vm1843_vm5, %v4425_v19, %v1200_v61 }
 0x26c   : > { %v1168_v28 = vpop.permute.xlu0 %1167 }
 0x26d   : > { %v1859_v48 = vsel %vm1843_vm5, %v4426_v36, %v1168_v28 }
 0x26e   : > { %v1326_v39 = vpop.permute.xlu1 %1325 }
 0x26f   : > { %v1907_v38 = vsel %vm1876_vm6, %v1874_v10, %v1326_v39 }
 0x270   : > { %v1294_v12 = vpop.permute.xlu0 %1293 }
 0x271   : > { %v1891_v15 = vsel %vm1876_vm6, %v1858_v31, %v1294_v12 }
 0x272   : > { %v1708_v0 = vpop.permute.xlu1 %1707 }
 0x273   : > { %v2005_v24 = vsel %vm1975_vm9, %v1972_v43, %v1708_v0 }
 0x274   : > { %v1676_v33 = vpop.permute.xlu0 %1675  ;;  %2633 = vmatmul.mubr.msk.f32.gmra.mrb[12].mxu1 %vm2020_vm10, %v2005_v24 }
 0x275   : > { %v1989_v57 = vsel %vm1975_vm9, %v1956_v14, %v1676_v33 }
 0x276   : > { %2609 = vmatmul.mubr.msk.f32.gmra.mrb[12].mxu0 %vm2020_vm10, %v1989_v57  ;;  %v1328_v6 = vpop.permute.xlu1 %1327 }
 0x277   : > { %v1908_v55 = vsel %vm1876_vm6, %v1875_v11, %v1328_v6 }
 0x278   : > { %v1296_v30 = vpop.permute.xlu0 %1295 }
 0x279   : > { %v1892_v54 = vsel %vm1876_vm6, %v1859_v48, %v1296_v30 }
 0x27a   : > { %v1454_v40 = vpop.permute.xlu1 %1453 }
 0x27b   : > { %v1940_v45 = vsel %vm1909_vm7, %v1907_v38, %v1454_v40 }
 0x27c   : > { %v1422_v42 = vpop.permute.xlu0 %1421 }
 0x27d   : > { %v1924_v53 = vsel %vm1909_vm7, %v1891_v15, %v1422_v42 }
 0x27e   : > { %v1456_v3 = vpop.permute.xlu1 %1455 }
 0x27f   : > { %v2595_v34 = vpop.f32.mrb[2].mxu0  ;;  %v1941_v25 = vsel %vm1909_vm7, %v1908_v55, %v1456_v3 }
 0x280   : > { %v1424_v27 = vpop.permute.xlu0 %1423  ;;  %v2203_v2 = vadd.f32 %v2595_v34, %v4090_v60  ;;  %v2197_v9 = vpop.f32.mrb[3].mxu0 }
 0x281   : > { %v2198_v59 = vadd.f32 %v4090_v60, %v2197_v9  ;;  %v1925_v61 = vsel %vm1909_vm7, %v1892_v54, %v1424_v27 }
 0x282   : > { %2349 = vst.msk [vmem:[%s4095_s28 + $0x18] sm:$0xff] %vm1777_vm3, %v2203_v2  ;;  %v1582_v4 = vpop.permute.xlu1 %1581 }
 0x283   : > { %2348 = vst.msk [vmem:[%s4095_s28 + $0x10] sm:$0xff] %vm1777_vm3, %v2198_v59  ;;  %v1973_v46 = vsel %vm1942_vm8, %v1940_v45, %v1582_v4 }
 0x284   : > { %v1550_v41 = vpop.permute.xlu0 %1549 }
 0x285   : > { %v2619_v20 = vpop.f32.mrb[2].mxu1  ;;  %v1957_v13 = vsel %vm1942_vm8, %v1924_v53, %v1550_v41 }
 0x286   : > { %v2283_v37 = vadd.f32 %v2619_v20, %v4090_v60  ;;  %v2277_v51 = vpop.f32.mrb[3].mxu1  ;;  %v1584_v7 = vpop.permute.xlu1 %1583 }
 0x287   : > { %v2278_v44 = vadd.f32 %v4090_v60, %v2277_v51  ;;  %v1974_v18 = vsel %vm1942_vm8, %v1941_v25, %v1584_v7 }
 0x288   : > { %2365 = vst.msk [vmem:[%s4095_s28 + $0x98] sm:$0xff] %vm1777_vm3, %v2283_v37  ;;  %v1552_v1 = vpop.permute.xlu0 %1551 }
 0x289   : > { %2364 = vst.msk [vmem:[%s4095_s28 + $0x90] sm:$0xff] %vm1777_vm3, %v2278_v44  ;;  %v1958_v28 = vsel %vm1942_vm8, %v1925_v61, %v1552_v1 }
 0x28a   : > { %v1710_v50 = vpop.permute.xlu1 %1709 }
 0x28b   : > { %v2006_v17 = vsel %vm1975_vm9, %v1973_v46, %v1710_v50 }
 0x28c   : > { %v1678_v21 = vpop.permute.xlu0 %1677  ;;  %2635 = vmatprep.mubr.msk.f32.mxu1 %vm2020_vm10, %v2006_v17 }
 0x28d   : > { %v1990_v5 = vsel %vm1975_vm9, %v1957_v13, %v1678_v21 }
 0x28e   : > { %2611 = vmatprep.mubr.msk.f32.mxu0 %vm2020_vm10, %v1990_v5  ;;  %v1712_v29 = vpop.permute.xlu1 %1711 }
 0x28f   : > { %v2007_v49 = vsel %vm1975_vm9, %v1974_v18, %v1712_v29 }
 0x290   : > { %v1680_v62 = vpop.permute.xlu0 %1679  ;;  %2636 = vmatmul.mubr.msk.f32.gmra.mrb[14].mxu1 %vm2020_vm10, %v2007_v49 }
 0x291   : > { %v1991_v8 = vsel %vm1975_vm9, %v1958_v28, %v1680_v62 }
 0x292   : > { %2612 = vmatmul.mubr.msk.f32.gmra.mrb[14].mxu0 %vm2020_vm10, %v1991_v8 }
 0x2a7   : > { %v2622_v47 = vpop.f32.mrb[4].mxu1 }
 0x2a8   : > { %v2293_v39 = vadd.f32 %v2622_v47, %v4090_v60  ;;  %v2287_v63 = vpop.f32.mrb[5].mxu1 }
 0x2a9   : > { %v2598_v32 = vpop.f32.mrb[4].mxu0  ;;  %v2288_v52 = vadd.f32 %v4090_v60, %v2287_v63 }
 0x2aa   : > { %v2213_v12 = vadd.f32 %v2598_v32, %v4090_v60  ;;  %v2207_v35 = vpop.f32.mrb[5].mxu0  ;;  %2367 = vst.msk [vmem:[%s4095_s28 + $0xa8] sm:$0xff] %vm1777_vm3, %v2293_v39 }
 0x2ab   : > { %v2208_v26 = vadd.f32 %v4090_v60, %v2207_v35  ;;  %2366 = vst.msk [vmem:[%s4095_s28 + $0xa0] sm:$0xff] %vm1777_vm3, %v2288_v52 }
 0x2ac   : > { %2351 = vst.msk [vmem:[%s4095_s28 + $0x28] sm:$0xff] %vm1777_vm3, %v2213_v12 }
 0x2ad   : > { %2350 = vst.msk [vmem:[%s4095_s28 + $0x20] sm:$0xff] %vm1777_vm3, %v2208_v26 }
 0x2cf   : > { %v2625_v56 = vpop.f32.mrb[6].mxu1 }
 0x2d0   : > { %v2303_v22 = vadd.f32 %v2625_v56, %v4090_v60  ;;  %v2297_v43 = vpop.f32.mrb[7].mxu1 }
 0x2d1   : > { %v2601_v16 = vpop.f32.mrb[6].mxu0  ;;  %v2298_v24 = vadd.f32 %v4090_v60, %v2297_v43 }
 0x2d2   : > { %v2223_v0 = vadd.f32 %v2601_v16, %v4090_v60  ;;  %v2217_v14 = vpop.f32.mrb[7].mxu0  ;;  %2369 = vst.msk [vmem:[%s4095_s28 + $0xb8] sm:$0xff] %vm1777_vm3, %v2303_v22 }
 0x2d3   : > { %v2218_v33 = vadd.f32 %v4090_v60, %v2217_v14  ;;  %2368 = vst.msk [vmem:[%s4095_s28 + $0xb0] sm:$0xff] %vm1777_vm3, %v2298_v24 }
 0x2d4   : > { %2353 = vst.msk [vmem:[%s4095_s28 + $0x38] sm:$0xff] %vm1777_vm3, %v2223_v0 }
 0x2d5   : > { %2352 = vst.msk [vmem:[%s4095_s28 + $0x30] sm:$0xff] %vm1777_vm3, %v2218_v33 }
 0x2f7   : > { %v2628_v57 = vpop.f32.mrb[8].mxu1 }
 0x2f8   : > { %v2313_v30 = vadd.f32 %v2628_v57, %v4090_v60  ;;  %v2307_v40 = vpop.f32.mrb[9].mxu1 }
 0x2f9   : > { %v2604_v6 = vpop.f32.mrb[8].mxu0  ;;  %v2308_v27 = vadd.f32 %v4090_v60, %v2307_v40 }
 0x2fa   : > { %v2233_v42 = vadd.f32 %v2604_v6, %v4090_v60  ;;  %v2227_v3 = vpop.f32.mrb[9].mxu0  ;;  %2371 = vst.msk [vmem:[%s4095_s28 + $0xc8] sm:$0xff] %vm1777_vm3, %v2313_v30 }
 0x2fb   : > { %v2228_v34 = vadd.f32 %v4090_v60, %v2227_v3  ;;  %2370 = vst.msk [vmem:[%s4095_s28 + $0xc0] sm:$0xff] %vm1777_vm3, %v2308_v27 }
 0x2fc   : > { %2355 = vst.msk [vmem:[%s4095_s28 + $0x48] sm:$0xff] %vm1777_vm3, %v2233_v42 }
 0x2fd   : > { %2354 = vst.msk [vmem:[%s4095_s28 + $0x40] sm:$0xff] %vm1777_vm3, %v2228_v34 }
 0x31f   : > { %v2631_v2 = vpop.f32.mrb[10].mxu1 }
 0x320   : > { %v2323_v59 = vadd.f32 %v2631_v2, %v4090_v60  ;;  %v2317_v4 = vpop.f32.mrb[11].mxu1 }
 0x321   : > { %v2607_v9 = vpop.f32.mrb[10].mxu0  ;;  %v2318_v37 = vadd.f32 %v4090_v60, %v2317_v4 }
 0x322   : > { %v2243_v41 = vadd.f32 %v2607_v9, %v4090_v60  ;;  %v2237_v20 = vpop.f32.mrb[11].mxu0  ;;  %2373 = vst.msk [vmem:[%s4095_s28 + $0xd8] sm:$0xff] %vm1777_vm3, %v2323_v59 }
 0x323   : > { %v2238_v51 = vadd.f32 %v4090_v60, %v2237_v20  ;;  %2372 = vst.msk [vmem:[%s4095_s28 + $0xd0] sm:$0xff] %vm1777_vm3, %v2318_v37 }
 0x324   : > { %2357 = vst.msk [vmem:[%s4095_s28 + $0x58] sm:$0xff] %vm1777_vm3, %v2243_v41 }
 0x325   : > { %2356 = vst.msk [vmem:[%s4095_s28 + $0x50] sm:$0xff] %vm1777_vm3, %v2238_v51 }
 0x347   : > { %v2634_v44 = vpop.f32.mrb[12].mxu1 }
 0x348   : > { %v2333_v23 = vadd.f32 %v2634_v44, %v4090_v60  ;;  %v2327_v10 = vpop.f32.mrb[13].mxu1 }
 0x349   : > { %v2610_v7 = vpop.f32.mrb[12].mxu0  ;;  %v2328_v31 = vadd.f32 %v4090_v60, %v2327_v10 }
 0x34a   : > { %v2253_v1 = vadd.f32 %v2610_v7, %v4090_v60  ;;  %v2247_v58 = vpop.f32.mrb[13].mxu0  ;;  %2375 = vst.msk [vmem:[%s4095_s28 + $0xe8] sm:$0xff] %vm1777_vm3, %v2333_v23 }
 0x34b   : > { %v2248_v38 = vadd.f32 %v4090_v60, %v2247_v58  ;;  %2374 = vst.msk [vmem:[%s4095_s28 + $0xe0] sm:$0xff] %vm1777_vm3, %v2328_v31 }
 0x34c   : > { %2359 = vst.msk [vmem:[%s4095_s28 + $0x68] sm:$0xff] %vm1777_vm3, %v2253_v1 }
 0x34d   : > { %2358 = vst.msk [vmem:[%s4095_s28 + $0x60] sm:$0xff] %vm1777_vm3, %v2248_v38 }
 0x363   : > { %v2637_v15 = vpop.f32.mrb[14].mxu1 }
 0x364   : > { %v2343_v53 = vadd.f32 %v2637_v15, %v4090_v60  ;;  %v2337_v46 = vpop.f32.mrb[15].mxu1 }
 0x365   : > { %v2613_v45 = vpop.f32.mrb[14].mxu0  ;;  %v2338_v11 = vadd.f32 %v4090_v60, %v2337_v46 }
 0x366   : > { %v2263_v50 = vadd.f32 %v2613_v45, %v4090_v60  ;;  %v2257_v19 = vpop.f32.mrb[15].mxu0  ;;  %2377 = vst.msk [vmem:[%s4095_s28 + $0xf8] sm:$0xff] %vm1777_vm3, %v2343_v53 }
 0x367   : > { %v2258_v13 = vadd.f32 %v4090_v60, %v2257_v19  ;;  %2376 = vst.msk [vmem:[%s4095_s28 + $0xf0] sm:$0xff] %vm1777_vm3, %v2338_v11 }
 0x368   : > { %2361 = vst.msk [vmem:[%s4095_s28 + $0x78] sm:$0xff] %vm1777_vm3, %v2263_v50 }
 0x369   : > { %2360 = vst.msk [vmem:[%s4095_s28 + $0x70] sm:$0xff] %vm1777_vm3, %v2258_v13 }
 0x36a PF: > { %s14_s17 = sadd.s32 1, %s2723_s17   ;;  %s4427_s15 = smov %s2719_s16 }
 0x36b   : > { %p11_p5 = scmp.ge.s32.totalorder %s14_s17, 4   ;;  %s4428_s16 = smov %s4430_s18 }
 0x36d   :  { %13 = sbr.rel (!%p11_p5) target bundleno = 2 (0x2), region = 72 }

</bundles_post_ra>
